<compile_context>
chip_gen: v7x
topology: tpu7x:2x2x1
jax: 0.10.0
libtpu: 0.0.40
codegen_flags: <defaults>
</compile_context>

<pallas_src>
import jax
import jax.numpy as jnp
from jax.experimental import pallas as pl
from jax.experimental.pallas import tpu as pltpu

EPS = 1e-5
LANE = 128


def _ceil_to(n, m):
    return ((n + m - 1) // m) * m


def _pad_last(a, target):
    pad = target - a.shape[-1]
    if pad == 0:
        return a
    return jnp.pad(a, [(0, 0)] * (a.ndim - 1) + [(0, pad)])


def _pad2(a, rows, cols):
    if a.shape == (rows, cols):
        return a
    return jnp.pad(a, ((0, rows - a.shape[0]), (0, cols - a.shape[1])))


def prepare_params(params, *, matmul_dtype=jnp.bfloat16):
    """One-time prep: pad to lane-dense shapes, fuse QKV, fold the attention
    scale into wq, and pre-cast matmul weights to bf16 (LN params and biases
    stay f32).  Doing this once at init keeps per-call wrapper work at zero
    (no un-hidden XLA pad/cast ops on the weights)."""
    C, H = params["wk"].shape
    F = params["wf1"].shape[1]
    Cp, Hp, Fp = _ceil_to(C, LANE), _ceil_to(H, LANE), _ceil_to(F, LANE)
    scale = float(C) ** -0.5            # PyTorch Head: c ** (-0.5), c = n_inputs

    wk = _pad2(params["wk"], Cp, Hp)
    wq = _pad2(params["wq"] * scale, Cp, Hp)   # fold score scale into wq
    wv = _pad2(params["wv"], Cp, Hp)
    return {
        "C": C, "H": H, "F": F, "Cp": Cp, "Hp": Hp, "Fp": Fp,
        # Fused QKV projection: one MXU LHS push instead of three.
        "wqkv": jnp.concatenate([wk, wq, wv], axis=1).astype(matmul_dtype),
        "wo": _pad2(params["wo"], Hp, Cp).astype(matmul_dtype),
        "wf1": _pad2(params["wf1"], Cp, Fp).astype(matmul_dtype),
        "wf2": _pad2(params["wf2"], Fp, Cp).astype(matmul_dtype),
        # LayerNorm params and biases stay f32; padded lanes are ZERO (this
        # invariant is what keeps LN stats / residual math exact).
        "ln1_g": _pad_last(params["ln1_g"], Cp),
        "ln1_b": _pad_last(params["ln1_b"], Cp),
        "ln2_g": _pad_last(params["ln2_g"], Cp),
        "ln2_b": _pad_last(params["ln2_b"], Cp),
        "bf1": _pad_last(params["bf1"], Fp),
        "bf2": _pad_last(params["bf2"], Cp),
    }


def _make_kernel(C, T, BB):
    """Kernel closure over static sizes. C/T are the true (unpadded) dims."""
    inv_c = 1.0 / float(C)

    def kernel(x_ref, g1_ref, b1_ref, wqkv_ref, wo_ref, g2_ref, b2_ref,
               wf1_ref, bf1_ref, wf2_ref, bf2_ref, o_ref):
        Cp = x_ref.shape[-1]
        Hp = wo_ref.shape[0]
        M = BB * T
        mm_dtype = wqkv_ref.dtype        # bf16 matmul operands, f32 accumulate

        # Fold (BB, T) -> M for all projections / FFN matmuls (leading-dim
        # merge only; the 128-lane minor dim is untouched).
        x = x_ref[...].reshape(M, Cp)

        # Read parameters once (hoisted; no per-LN re-broadcast).
        g1 = g1_ref[...]; b1 = b1_ref[...]
        g2 = g2_ref[...]; b2 = b2_ref[...]
        bf1 = bf1_ref[...]; bf2 = bf2_ref[...]

        if Cp == C:
            def center(z, mu):
                return z - mu
        else:
            # compile-time constant mask: 1 on true channel lanes, 0 on pad
            lane_mask = (jax.lax.broadcasted_iota(jnp.int32, (1, Cp), 1)
                         < C).astype(jnp.float32)

            def center(z, mu):
                # zero the padded lanes so they don't pollute the variance
                return (z - mu) * lane_mask

        def layernorm(z, g, b):
            # Robust two-pass variance (review: E[x^2]-mu^2 is cancellation
            # prone at real scale).  Padded lanes of z are zero, so lane sums
            # over Cp equal sums over the true C; divide by the true C.
            mu = jnp.sum(z, axis=-1, keepdims=True) * inv_c
            d = center(z, mu)
            var = jnp.sum(d * d, axis=-1, keepdims=True) * inv_c
            rstd = jax.lax.rsqrt(var + EPS)
            # gamma/beta are zero on padded lanes -> output stays zero there.
            return d * rstd * g + b

        # ---------- attention branch: x + sa(ln1(x)) ----------
        h = layernorm(x, g1, b1)                                 # (M, Cp) f32
        qkv = jnp.dot(h.astype(mm_dtype), wqkv_ref[...],
                      preferred_element_type=jnp.float32)        # (M, 3*Hp)
        # static 128-lane-aligned column slices of the fused projection
        k = qkv[:, 0:Hp].reshape(BB, T, Hp).astype(mm_dtype)
        q = qkv[:, Hp:2 * Hp].reshape(BB, T, Hp).astype(mm_dtype)
        vv = qkv[:, 2 * Hp:3 * Hp].reshape(BB, T, Hp).astype(mm_dtype)

        # Score scale already folded into wq; contract the head dim directly
        # (no explicit k transpose / XLU work).
        # TODO(synk): flash-tile over KV blocks (online softmax) once T grows
        # so the (BB,T,T) f32 scores never materialize and KV tiles stay
        # 128-lane dense.
        wei = jnp.einsum("bqh,bkh->bqk", q, k,
                         preferred_element_type=jnp.float32)     # (BB,T,T)
        wei = wei - jnp.max(wei, axis=-1, keepdims=True)
        p = jnp.exp(wei)
        denom = jnp.sum(p, axis=-1, keepdims=True)
        p = p * pl.reciprocal(denom, approx=True)   # EUP slot, not VALU divide
        # dropout(p) / dropout in ffwd: identity (eval-mode semantics).

        att = jnp.einsum("bqk,bkh->bqh", p.astype(mm_dtype), vv,
                         preferred_element_type=jnp.float32)     # (BB,T,Hp)
        sa = jnp.dot(att.reshape(M, Hp).astype(mm_dtype), wo_ref[...],
                     preferred_element_type=jnp.float32)         # (M, Cp)
        x1 = x + sa

        # ---------- feed-forward branch: x1 + ffwd(ln2(x1)) ----------
        h2 = layernorm(x1, g2, b2)
        f = jnp.dot(h2.astype(mm_dtype), wf1_ref[...],
                    preferred_element_type=jnp.float32) + bf1
        f = jnp.maximum(f, 0.0)                                  # ReLU
        f = jnp.dot(f.astype(mm_dtype), wf2_ref[...],
                    preferred_element_type=jnp.float32) + bf2

        # Lane-dense store: last dim Cp is a multiple of 128 -> unmasked vst.
        o_ref[...] = (x1 + f).reshape(BB, T, Cp)

    return kernel


def block_forward(x, prep, *, batch_block=None):
    """x: (B, T, C) float32. prep: output of prepare_params()."""
    B, T, C = x.shape
    assert C == prep["C"]
    Cp, Hp, Fp = prep["Cp"], prep["Hp"], prep["Fp"]

    # Single grid step by default: v5e/v6e have one TensorCore, so extra grid
    # steps only serialize and pay ~0.35us/step overhead, while G=1 maximizes
    # the matmul M (= B*T rows) per MXU pass.
    # TODO(synk): on v7x pass batch_block=B//2 so the two TensorCores share
    # the batch (core-sharded grid); target batch_block*T >= 256 at real size.
    if batch_block is None:
        batch_block = B
    BB = batch_block
    assert B % BB == 0, "B must be divisible by batch_block"
    G = B // BB

    if x.dtype != jnp.float32:
        x = x.astype(jnp.float32)
    xp = _pad_last(x, Cp)        # no-op when C is already a multiple of 128

    consts = (prep["ln1_g"], prep["ln1_b"], prep["wqkv"], prep["wo"],
              prep["ln2_g"], prep["ln2_b"], prep["wf1"], prep["bf1"],
              prep["wf2"], prep["bf2"])

    # Scoped-VMEM budget from the actual block footprint (weights effectively
    # single-buffered, x/out blocks double-buffered), with generous headroom.
    weight_bytes = sum(int(a.size) * a.dtype.itemsize for a in consts)
    io_bytes = 2 * 2 * BB * T * Cp * 4
    vmem_limit = min(100 << 20, max(32 << 20, 4 * (weight_bytes + io_bytes)))

    out_shape = jax.ShapeDtypeStruct((B, T, Cp), jnp.float32)

    def call(weight_pipeline_mode):
        def const_spec(shape):
            kwargs = ({} if weight_pipeline_mode is None
                      else {"pipeline_mode": weight_pipeline_mode})
            # Whole array, constant block index across the grid.
            return pl.BlockSpec(shape, lambda gi: tuple(0 for _ in shape),
                                **kwargs)

        in_specs = [
            pl.BlockSpec((BB, T, Cp), lambda gi: (gi, 0, 0)),    # x (blocked)
            const_spec((1, Cp)), const_spec((1, Cp)),            # ln1 g/b
            const_spec((Cp, 3 * Hp)),                            # fused wqkv
            const_spec((Hp, Cp)),                                # wo
            const_spec((1, Cp)), const_spec((1, Cp)),            # ln2 g/b
            const_spec((Cp, Fp)), const_spec((1, Fp)),           # ffwd lin 1
            const_spec((Fp, Cp)), const_spec((1, Cp)),           # ffwd lin 2
        ]
        return pl.pallas_call(
            _make_kernel(C, T, BB),
            out_shape=out_shape,
            grid_spec=pltpu.PrefetchScalarGridSpec(
                num_scalar_prefetch=0,
                grid=(G,),
                in_specs=in_specs,
                out_specs=pl.BlockSpec((BB, T, Cp), lambda gi: (gi, 0, 0)),
            ),
            compiler_params=pltpu.CompilerParams(
                dimension_semantics=("parallel",),
                vmem_limit_bytes=int(vmem_limit)),
        )(xp, *consts)

    try:
        # constant-index weight blocks gain nothing from double-buffering
        out = call(pl.Buffered(1))
    except Exception:
        # fall back if this jax build rejects single-buffered pipeline_mode
        out = call(None)

    return out[..., :C] if Cp != C else out


def init_params(key, n_inputs, n_hidden):
    C, H = n_inputs, n_hidden
    ks = jax.random.split(key, 8)
    s = 0.02
    return {
        # Linear weights stored already transposed: y = x @ W
        "wk": s * jax.random.normal(ks[0], (C, H), jnp.float32),
        "wq": s * jax.random.normal(ks[1], (C, H), jnp.float32),
        "wv": s * jax.random.normal(ks[2], (C, H), jnp.float32),
        "wo": s * jax.random.normal(ks[3], (H, C), jnp.float32),
        "ln1_g": jnp.ones((1, C), jnp.float32),
        "ln1_b": jnp.zeros((1, C), jnp.float32),
        "ln2_g": jnp.ones((1, C), jnp.float32),
        "ln2_b": jnp.zeros((1, C), jnp.float32),
        "wf1": s * jax.random.normal(ks[4], (C, 4 * C), jnp.float32),
        "bf1": s * jax.random.normal(ks[5], (1, 4 * C), jnp.float32),
        "wf2": s * jax.random.normal(ks[6], (4 * C, C), jnp.float32),
        "bf2": s * jax.random.normal(ks[7], (1, C), jnp.float32),
    }


def block_reference(x, p):
    """Pure-JAX f32 reference matching Block.forward (eval mode, no mask)."""
    def ln(v, g, b):
        mu = jnp.mean(v, axis=-1, keepdims=True)
        var = jnp.mean((v - mu) ** 2, axis=-1, keepdims=True)
        return (v - mu) / jnp.sqrt(var + EPS) * g + b

    C = x.shape[-1]
    h = ln(x, p["ln1_g"], p["ln1_b"])
    k = h @ p["wk"]; q = h @ p["wq"]; v = h @ p["wv"]
    wei = jnp.einsum("btd,bsd->bts", q, k) * (C ** -0.5)
    wei = jax.nn.softmax(wei, axis=-1)
    sa = (wei @ v) @ p["wo"]
    x1 = x + sa
    h2 = ln(x1, p["ln2_g"], p["ln2_b"])
    f = jnp.maximum(h2 @ p["wf1"] + p["bf1"], 0.0) @ p["wf2"] + p["bf2"]
    return x1 + f


if __name__ == "__main__":
    B, T, C, H = 4, 8, 32, 16   # batch, seq, n_inputs, n_hidden
    key = jax.random.PRNGKey(0)
    kx, kp = jax.random.split(key)
    x = jax.random.normal(kx, (B, T, C), jnp.float32)
    params = init_params(kp, C, H)
    prep = prepare_params(params)        # one-time pad / QKV-fuse / bf16 cast

    out = jax.block_until_ready(block_forward(x, prep))
    ref = block_reference(x, params)

    assert out.shape == (B, T, C)
    max_err = float(jnp.max(jnp.abs(out - ref)))
    # tolerance covers bf16 matmul operands + the EUP approximate reciprocal
    assert jnp.allclose(out, ref, atol=5e-3, rtol=5e-3), f"mismatch: {max_err}"
    print("KERNEL_OK")
</pallas_src>

<mosaic_0001>
module attributes {stable_mosaic.version = 11 : i64} {
  func.func @kernel(%arg0: i32, %arg1: memref<4x8x128xf32, #tpu.memory_space<vmem>>, %arg2: memref<1x128xf32, #tpu.memory_space<vmem>>, %arg3: memref<1x128xf32, #tpu.memory_space<vmem>>, %arg4: memref<128x384xbf16, #tpu.memory_space<vmem>>, %arg5: memref<128x128xbf16, #tpu.memory_space<vmem>>, %arg6: memref<1x128xf32, #tpu.memory_space<vmem>>, %arg7: memref<1x128xf32, #tpu.memory_space<vmem>>, %arg8: memref<128x128xbf16, #tpu.memory_space<vmem>>, %arg9: memref<1x128xf32, #tpu.memory_space<vmem>>, %arg10: memref<128x128xbf16, #tpu.memory_space<vmem>>, %arg11: memref<1x128xf32, #tpu.memory_space<vmem>>, %arg12: memref<4x8x128xf32, #tpu.memory_space<vmem>>) attributes {dimension_semantics = [#tpu.dimension_semantics<parallel>], iteration_bounds = array<i64: 1>, scalar_prefetch = 0 : i64, scratch_operands = 0 : i64, tpu.core_type = #tpu.core_type<tc>, window_params = [{transform_indices = @transform_0, window_bounds = array<i64: 4, 8, 128>}, {pipeline_mode = #tpu.pipeline_mode<synchronous>, transform_indices = @transform_1, window_bounds = array<i64: 1, 128>}, {pipeline_mode = #tpu.pipeline_mode<synchronous>, transform_indices = @transform_2, window_bounds = array<i64: 1, 128>}, {pipeline_mode = #tpu.pipeline_mode<synchronous>, transform_indices = @transform_3, window_bounds = array<i64: 128, 384>}, {pipeline_mode = #tpu.pipeline_mode<synchronous>, transform_indices = @transform_4, window_bounds = array<i64: 128, 128>}, {pipeline_mode = #tpu.pipeline_mode<synchronous>, transform_indices = @transform_5, window_bounds = array<i64: 1, 128>}, {pipeline_mode = #tpu.pipeline_mode<synchronous>, transform_indices = @transform_6, window_bounds = array<i64: 1, 128>}, {pipeline_mode = #tpu.pipeline_mode<synchronous>, transform_indices = @transform_7, window_bounds = array<i64: 128, 128>}, {pipeline_mode = #tpu.pipeline_mode<synchronous>, transform_indices = @transform_8, window_bounds = array<i64: 1, 128>}, {pipeline_mode = #tpu.pipeline_mode<synchronous>, transform_indices = @transform_9, window_bounds = array<i64: 128, 128>}, {pipeline_mode = #tpu.pipeline_mode<synchronous>, transform_indices = @transform_10, window_bounds = array<i64: 1, 128>}, {transform_indices = @transform_11, window_bounds = array<i64: 4, 8, 128>}]} {
    %c0 = arith.constant 0 : index
    %c0_0 = arith.constant 0 : index
    %c0_1 = arith.constant 0 : index
    %0 = vector.load %arg1[%c0, %c0_0, %c0_1] : memref<4x8x128xf32, #tpu.memory_space<vmem>>, vector<4x8x128xf32>
    %1 = vector.shape_cast %0 : vector<4x8x128xf32> to vector<32x128xf32>
    %c0_2 = arith.constant 0 : index
    %c0_3 = arith.constant 0 : index
    %2 = vector.load %arg2[%c0_2, %c0_3] : memref<1x128xf32, #tpu.memory_space<vmem>>, vector<1x128xf32>
    %c0_4 = arith.constant 0 : index
    %c0_5 = arith.constant 0 : index
    %3 = vector.load %arg3[%c0_4, %c0_5] : memref<1x128xf32, #tpu.memory_space<vmem>>, vector<1x128xf32>
    %c0_6 = arith.constant 0 : index
    %c0_7 = arith.constant 0 : index
    %4 = vector.load %arg6[%c0_6, %c0_7] : memref<1x128xf32, #tpu.memory_space<vmem>>, vector<1x128xf32>
    %c0_8 = arith.constant 0 : index
    %c0_9 = arith.constant 0 : index
    %5 = vector.load %arg7[%c0_8, %c0_9] : memref<1x128xf32, #tpu.memory_space<vmem>>, vector<1x128xf32>
    %c0_10 = arith.constant 0 : index
    %c0_11 = arith.constant 0 : index
    %6 = vector.load %arg9[%c0_10, %c0_11] : memref<1x128xf32, #tpu.memory_space<vmem>>, vector<1x128xf32>
    %c0_12 = arith.constant 0 : index
    %c0_13 = arith.constant 0 : index
    %7 = vector.load %arg11[%c0_12, %c0_13] : memref<1x128xf32, #tpu.memory_space<vmem>>, vector<1x128xf32>
    %8 = tpu.iota {dimensions = array<i32: 1>} : vector<1x128xi32>
    %c32_i32 = arith.constant 32 : i32
    %9 = vector.broadcast %c32_i32 : i32 to vector<1x128xi32>
    %10 = arith.cmpi slt, %8, %9 : vector<1x128xi32>
    %11 = arith.extui %10 : vector<1x128xi1> to vector<1x128xi32>
    %12 = arith.sitofp %11 : vector<1x128xi32> to vector<1x128xf32>
    %cst = arith.constant dense<0.000000e+00> : vector<32xf32>
    %13 = vector.multi_reduction <add>, %1, %cst [1] : vector<32x128xf32> to vector<32xf32>
    %14 = vector.shape_cast %13 : vector<32xf32> to vector<32x1xf32>
    %cst_14 = arith.constant 3.125000e-02 : f32
    %15 = vector.broadcast %cst_14 : f32 to vector<32x1xf32>
    %16 = arith.mulf %14, %15 : vector<32x1xf32>
    %17 = vector.broadcast %16 : vector<32x1xf32> to vector<32x128xf32>
    %18 = arith.subf %1, %17 : vector<32x128xf32>
    %19 = vector.broadcast %12 : vector<1x128xf32> to vector<32x128xf32>
    %20 = arith.mulf %18, %19 : vector<32x128xf32>
    %21 = arith.mulf %20, %20 : vector<32x128xf32>
    %cst_15 = arith.constant dense<0.000000e+00> : vector<32xf32>
    %22 = vector.multi_reduction <add>, %21, %cst_15 [1] : vector<32x128xf32> to vector<32xf32>
    %23 = vector.shape_cast %22 : vector<32xf32> to vector<32x1xf32>
    %cst_16 = arith.constant 3.125000e-02 : f32
    %24 = vector.broadcast %cst_16 : f32 to vector<32x1xf32>
    %25 = arith.mulf %23, %24 : vector<32x1xf32>
    %cst_17 = arith.constant 9.99999974E-6 : f32
    %26 = vector.broadcast %cst_17 : f32 to vector<32x1xf32>
    %27 = arith.addf %25, %26 : vector<32x1xf32>
    %28 = math.rsqrt %27 : vector<32x1xf32>
    %29 = vector.broadcast %28 : vector<32x1xf32> to vector<32x128xf32>
    %30 = arith.mulf %20, %29 : vector<32x128xf32>
    %31 = vector.broadcast %2 : vector<1x128xf32> to vector<32x128xf32>
    %32 = arith.mulf %30, %31 : vector<32x128xf32>
    %33 = vector.broadcast %3 : vector<1x128xf32> to vector<32x128xf32>
    %34 = arith.addf %32, %33 : vector<32x128xf32>
    %35 = arith.truncf %34 : vector<32x128xf32> to vector<32x128xbf16>
    %c0_18 = arith.constant 0 : index
    %c0_19 = arith.constant 0 : index
    %36 = vector.load %arg4[%c0_18, %c0_19] : memref<128x384xbf16, #tpu.memory_space<vmem>>, vector<128x384xbf16>
    %cst_20 = arith.constant dense<0.000000e+00> : vector<32x384xf32>
    %37 = tpu.matmul %35, %36, %cst_20 {dimension_numbers = #tpu.dot_dimension_numbers<[1], [0], [0], [1], [0, 0, 1, 1], [], []>} : vector<32x128xbf16>, vector<128x384xbf16>, vector<32x384xf32> -> vector<32x384xf32>
    %38 = vector.extract_strided_slice %37 {offsets = [0, 0], sizes = [32, 128], strides = [1, 1]} : vector<32x384xf32> to vector<32x128xf32>
    %39 = vector.shape_cast %38 : vector<32x128xf32> to vector<4x8x128xf32>
    %40 = arith.truncf %39 : vector<4x8x128xf32> to vector<4x8x128xbf16>
    %41 = vector.extract_strided_slice %37 {offsets = [0, 128], sizes = [32, 128], strides = [1, 1]} : vector<32x384xf32> to vector<32x128xf32>
    %42 = vector.shape_cast %41 : vector<32x128xf32> to vector<4x8x128xf32>
    %43 = arith.truncf %42 : vector<4x8x128xf32> to vector<4x8x128xbf16>
    %44 = vector.extract_strided_slice %37 {offsets = [0, 256], sizes = [32, 128], strides = [1, 1]} : vector<32x384xf32> to vector<32x128xf32>
    %45 = vector.shape_cast %44 : vector<32x128xf32> to vector<4x8x128xf32>
    %46 = arith.truncf %45 : vector<4x8x128xf32> to vector<4x8x128xbf16>
    "tpu.trace_start"() <{level = 10 : i32, message = "bqh,bkh->bqk"}> : () -> ()
    %cst_21 = arith.constant dense<0.000000e+00> : vector<4x8x8xf32>
    %47 = tpu.matmul %43, %40, %cst_21 {dimension_numbers = #tpu.dot_dimension_numbers<[2], [2], [1], [1], [0, 0, 0, 1, 1, 1], [0], [0]>} : vector<4x8x128xbf16>, vector<4x8x128xbf16>, vector<4x8x8xf32> -> vector<4x8x8xf32>
    "tpu.trace_stop"() : () -> ()
    %cst_22 = arith.constant dense<0xFF800000> : vector<4x8xf32>
    %48 = vector.multi_reduction <maximumf>, %47, %cst_22 [2] : vector<4x8x8xf32> to vector<4x8xf32>
    %49 = vector.shape_cast %48 : vector<4x8xf32> to vector<4x8x1xf32>
    %50 = vector.broadcast %49 : vector<4x8x1xf32> to vector<4x8x8xf32>
    %51 = arith.subf %47, %50 : vector<4x8x8xf32>
    %52 = math.exp %51 : vector<4x8x8xf32>
    %cst_23 = arith.constant dense<0.000000e+00> : vector<4x8xf32>
    %53 = vector.multi_reduction <add>, %52, %cst_23 [2] : vector<4x8x8xf32> to vector<4x8xf32>
    %54 = vector.shape_cast %53 : vector<4x8xf32> to vector<4x8x1xf32>
    %55 = tpu.reciprocal %54 {approx = true} : vector<4x8x1xf32> -> vector<4x8x1xf32>
    %56 = vector.broadcast %55 : vector<4x8x1xf32> to vector<4x8x8xf32>
    %57 = arith.mulf %52, %56 : vector<4x8x8xf32>
    %58 = arith.truncf %57 : vector<4x8x8xf32> to vector<4x8x8xbf16>
    "tpu.trace_start"() <{level = 10 : i32, message = "bqk,bkh->bqh"}> : () -> ()
    %cst_24 = arith.constant dense<0.000000e+00> : vector<4x8x128xf32>
    %59 = tpu.matmul %58, %46, %cst_24 {dimension_numbers = #tpu.dot_dimension_numbers<[2], [1], [1], [2], [0, 0, 0, 1, 1, 2], [0], [0]>} : vector<4x8x8xbf16>, vector<4x8x128xbf16>, vector<4x8x128xf32> -> vector<4x8x128xf32>
    "tpu.trace_stop"() : () -> ()
    %60 = vector.shape_cast %59 : vector<4x8x128xf32> to vector<32x128xf32>
    %61 = arith.truncf %60 : vector<32x128xf32> to vector<32x128xbf16>
    %c0_25 = arith.constant 0 : index
    %c0_26 = arith.constant 0 : index
    %62 = vector.load %arg5[%c0_25, %c0_26] : memref<128x128xbf16, #tpu.memory_space<vmem>>, vector<128x128xbf16>
    %cst_27 = arith.constant dense<0.000000e+00> : vector<32x128xf32>
    %63 = tpu.matmul %61, %62, %cst_27 {dimension_numbers = #tpu.dot_dimension_numbers<[1], [0], [0], [1], [0, 0, 1, 1], [], []>} : vector<32x128xbf16>, vector<128x128xbf16>, vector<32x128xf32> -> vector<32x128xf32>
    %64 = arith.addf %1, %63 : vector<32x128xf32>
    %cst_28 = arith.constant dense<0.000000e+00> : vector<32xf32>
    %65 = vector.multi_reduction <add>, %64, %cst_28 [1] : vector<32x128xf32> to vector<32xf32>
    %66 = vector.shape_cast %65 : vector<32xf32> to vector<32x1xf32>
    %cst_29 = arith.constant 3.125000e-02 : f32
    %67 = vector.broadcast %cst_29 : f32 to vector<32x1xf32>
    %68 = arith.mulf %66, %67 : vector<32x1xf32>
    %69 = vector.broadcast %68 : vector<32x1xf32> to vector<32x128xf32>
    %70 = arith.subf %64, %69 : vector<32x128xf32>
    %71 = vector.broadcast %12 : vector<1x128xf32> to vector<32x128xf32>
    %72 = arith.mulf %70, %71 : vector<32x128xf32>
    %73 = arith.mulf %72, %72 : vector<32x128xf32>
    %cst_30 = arith.constant dense<0.000000e+00> : vector<32xf32>
    %74 = vector.multi_reduction <add>, %73, %cst_30 [1] : vector<32x128xf32> to vector<32xf32>
    %75 = vector.shape_cast %74 : vector<32xf32> to vector<32x1xf32>
    %cst_31 = arith.constant 3.125000e-02 : f32
    %76 = vector.broadcast %cst_31 : f32 to vector<32x1xf32>
    %77 = arith.mulf %75, %76 : vector<32x1xf32>
    %cst_32 = arith.constant 9.99999974E-6 : f32
    %78 = vector.broadcast %cst_32 : f32 to vector<32x1xf32>
    %79 = arith.addf %77, %78 : vector<32x1xf32>
    %80 = math.rsqrt %79 : vector<32x1xf32>
    %81 = vector.broadcast %80 : vector<32x1xf32> to vector<32x128xf32>
    %82 = arith.mulf %72, %81 : vector<32x128xf32>
    %83 = vector.broadcast %4 : vector<1x128xf32> to vector<32x128xf32>
    %84 = arith.mulf %82, %83 : vector<32x128xf32>
    %85 = vector.broadcast %5 : vector<1x128xf32> to vector<32x128xf32>
    %86 = arith.addf %84, %85 : vector<32x128xf32>
    %87 = arith.truncf %86 : vector<32x128xf32> to vector<32x128xbf16>
    %c0_33 = arith.constant 0 : index
    %c0_34 = arith.constant 0 : index
    %88 = vector.load %arg8[%c0_33, %c0_34] : memref<128x128xbf16, #tpu.memory_space<vmem>>, vector<128x128xbf16>
    %cst_35 = arith.constant dense<0.000000e+00> : vector<32x128xf32>
    %89 = tpu.matmul %87, %88, %cst_35 {dimension_numbers = #tpu.dot_dimension_numbers<[1], [0], [0], [1], [0, 0, 1, 1], [], []>} : vector<32x128xbf16>, vector<128x128xbf16>, vector<32x128xf32> -> vector<32x128xf32>
    %90 = vector.broadcast %6 : vector<1x128xf32> to vector<32x128xf32>
    %91 = arith.addf %89, %90 : vector<32x128xf32>
    %cst_36 = arith.constant 0.000000e+00 : f32
    %92 = vector.broadcast %cst_36 : f32 to vector<32x128xf32>
    %93 = arith.maximumf %91, %92 : vector<32x128xf32>
    %94 = arith.truncf %93 : vector<32x128xf32> to vector<32x128xbf16>
    %c0_37 = arith.constant 0 : index
    %c0_38 = arith.constant 0 : index
    %95 = vector.load %arg10[%c0_37, %c0_38] : memref<128x128xbf16, #tpu.memory_space<vmem>>, vector<128x128xbf16>
    %cst_39 = arith.constant dense<0.000000e+00> : vector<32x128xf32>
    %96 = tpu.matmul %94, %95, %cst_39 {dimension_numbers = #tpu.dot_dimension_numbers<[1], [0], [0], [1], [0, 0, 1, 1], [], []>} : vector<32x128xbf16>, vector<128x128xbf16>, vector<32x128xf32> -> vector<32x128xf32>
    %97 = vector.broadcast %7 : vector<1x128xf32> to vector<32x128xf32>
    %98 = arith.addf %96, %97 : vector<32x128xf32>
    %99 = arith.addf %64, %98 : vector<32x128xf32>
    %100 = vector.shape_cast %99 : vector<32x128xf32> to vector<4x8x128xf32>
    %c0_40 = arith.constant 0 : index
    %c0_41 = arith.constant 0 : index
    %c0_42 = arith.constant 0 : index
    %101 = vector.load %arg12[%c0_40, %c0_41, %c0_42] : memref<4x8x128xf32, #tpu.memory_space<vmem>>, vector<4x8x128xf32>
    tpu.vector_store %arg12[%c0_40, %c0_41, %c0_42], %100 {strides = array<i32>} : memref<4x8x128xf32, #tpu.memory_space<vmem>>, vector<4x8x128xf32>,
    return
  }
  func.func @transform_0(%arg0: i32) -> (i32, i32, i32) {
    %c0_i32 = arith.constant 0 : i32
    %c0_i32_0 = arith.constant 0 : i32
    %c0_i32_1 = arith.constant 0 : i32
    return %arg0, %c0_i32, %c0_i32_0 : i32, i32, i32
  }
  func.func @transform_1(%arg0: i32) -> (i32, i32) {
    %c0_i32 = arith.constant 0 : i32
    %c0_i32_0 = arith.constant 0 : i32
    %c0_i32_1 = arith.constant 0 : i32
    return %c0_i32, %c0_i32_0 : i32, i32
  }
  func.func @transform_2(%arg0: i32) -> (i32, i32) {
    %c0_i32 = arith.constant 0 : i32
    %c0_i32_0 = arith.constant 0 : i32
    %c0_i32_1 = arith.constant 0 : i32
    return %c0_i32, %c0_i32_0 : i32, i32
  }
  func.func @transform_3(%arg0: i32) -> (i32, i32) {
    %c0_i32 = arith.constant 0 : i32
    %c0_i32_0 = arith.constant 0 : i32
    %c0_i32_1 = arith.constant 0 : i32
    return %c0_i32, %c0_i32_0 : i32, i32
  }
  func.func @transform_4(%arg0: i32) -> (i32, i32) {
    %c0_i32 = arith.constant 0 : i32
    %c0_i32_0 = arith.constant 0 : i32
    %c0_i32_1 = arith.constant 0 : i32
    return %c0_i32, %c0_i32_0 : i32, i32
  }
  func.func @transform_5(%arg0: i32) -> (i32, i32) {
    %c0_i32 = arith.constant 0 : i32
    %c0_i32_0 = arith.constant 0 : i32
    %c0_i32_1 = arith.constant 0 : i32
    return %c0_i32, %c0_i32_0 : i32, i32
  }
  func.func @transform_6(%arg0: i32) -> (i32, i32) {
    %c0_i32 = arith.constant 0 : i32
    %c0_i32_0 = arith.constant 0 : i32
    %c0_i32_1 = arith.constant 0 : i32
    return %c0_i32, %c0_i32_0 : i32, i32
  }
  func.func @transform_7(%arg0: i32) -> (i32, i32) {
    %c0_i32 = arith.constant 0 : i32
    %c0_i32_0 = arith.constant 0 : i32
    %c0_i32_1 = arith.constant 0 : i32
    return %c0_i32, %c0_i32_0 : i32, i32
  }
  func.func @transform_8(%arg0: i32) -> (i32, i32) {
    %c0_i32 = arith.constant 0 : i32
    %c0_i32_0 = arith.constant 0 : i32
    %c0_i32_1 = arith.constant 0 : i32
    return %c0_i32, %c0_i32_0 : i32, i32
  }
  func.func @transform_9(%arg0: i32) -> (i32, i32) {
    %c0_i32 = arith.constant 0 : i32
    %c0_i32_0 = arith.constant 0 : i32
    %c0_i32_1 = arith.constant 0 : i32
    return %c0_i32, %c0_i32_0 : i32, i32
  }
  func.func @transform_10(%arg0: i32) -> (i32, i32) {
    %c0_i32 = arith.constant 0 : i32
    %c0_i32_0 = arith.constant 0 : i32
    %c0_i32_1 = arith.constant 0 : i32
    return %c0_i32, %c0_i32_0 : i32, i32
  }
  func.func @transform_11(%arg0: i32) -> (i32, i32, i32) {
    %c0_i32 = arith.constant 0 : i32
    %c0_i32_0 = arith.constant 0 : i32
    %c0_i32_1 = arith.constant 0 : i32
    return %arg0, %c0_i32, %c0_i32_0 : i32, i32, i32
  }
}

module attributes {stable_mosaic.version = 11 : i64} {
  func.func @kernel(%arg0: i32, %arg1: memref<4x8x128xf32, #tpu.memory_space<vmem>>, %arg2: memref<1x128xf32, #tpu.memory_space<vmem>>, %arg3: memref<1x128xf32, #tpu.memory_space<vmem>>, %arg4: memref<128x384xbf16, #tpu.memory_space<vmem>>, %arg5: memref<128x128xbf16, #tpu.memory_space<vmem>>, %arg6: memref<1x128xf32, #tpu.memory_space<vmem>>, %arg7: memref<1x128xf32, #tpu.memory_space<vmem>>, %arg8: memref<128x128xbf16, #tpu.memory_space<vmem>>, %arg9: memref<1x128xf32, #tpu.memory_space<vmem>>, %arg10: memref<128x128xbf16, #tpu.memory_space<vmem>>, %arg11: memref<1x128xf32, #tpu.memory_space<vmem>>, %arg12: memref<4x8x128xf32, #tpu.memory_space<vmem>>) attributes {dimension_semantics = [#tpu.dimension_semantics<parallel>], iteration_bounds = array<i64: 1>, scalar_prefetch = 0 : i64, scratch_operands = 0 : i64, tpu.core_type = #tpu.core_type<tc>, window_params = [{transform_indices = @transform_0, window_bounds = array<i64: 4, 8, 128>}, {pipeline_mode = #tpu.pipeline_mode<synchronous>, transform_indices = @transform_1, window_bounds = array<i64: 1, 128>}, {pipeline_mode = #tpu.pipeline_mode<synchronous>, transform_indices = @transform_2, window_bounds = array<i64: 1, 128>}, {pipeline_mode = #tpu.pipeline_mode<synchronous>, transform_indices = @transform_3, window_bounds = array<i64: 128, 384>}, {pipeline_mode = #tpu.pipeline_mode<synchronous>, transform_indices = @transform_4, window_bounds = array<i64: 128, 128>}, {pipeline_mode = #tpu.pipeline_mode<synchronous>, transform_indices = @transform_5, window_bounds = array<i64: 1, 128>}, {pipeline_mode = #tpu.pipeline_mode<synchronous>, transform_indices = @transform_6, window_bounds = array<i64: 1, 128>}, {pipeline_mode = #tpu.pipeline_mode<synchronous>, transform_indices = @transform_7, window_bounds = array<i64: 128, 128>}, {pipeline_mode = #tpu.pipeline_mode<synchronous>, transform_indices = @transform_8, window_bounds = array<i64: 1, 128>}, {pipeline_mode = #tpu.pipeline_mode<synchronous>, transform_indices = @transform_9, window_bounds = array<i64: 128, 128>}, {pipeline_mode = #tpu.pipeline_mode<synchronous>, transform_indices = @transform_10, window_bounds = array<i64: 1, 128>}, {transform_indices = @transform_11, window_bounds = array<i64: 4, 8, 128>}]} {
    %c0 = arith.constant 0 : index
    %c0_0 = arith.constant 0 : index
    %c0_1 = arith.constant 0 : index
    %0 = vector.load %arg1[%c0, %c0_0, %c0_1] : memref<4x8x128xf32, #tpu.memory_space<vmem>>, vector<4x8x128xf32>
    %1 = vector.shape_cast %0 : vector<4x8x128xf32> to vector<32x128xf32>
    %c0_2 = arith.constant 0 : index
    %c0_3 = arith.constant 0 : index
    %2 = vector.load %arg2[%c0_2, %c0_3] : memref<1x128xf32, #tpu.memory_space<vmem>>, vector<1x128xf32>
    %c0_4 = arith.constant 0 : index
    %c0_5 = arith.constant 0 : index
    %3 = vector.load %arg3[%c0_4, %c0_5] : memref<1x128xf32, #tpu.memory_space<vmem>>, vector<1x128xf32>
    %c0_6 = arith.constant 0 : index
    %c0_7 = arith.constant 0 : index
    %4 = vector.load %arg6[%c0_6, %c0_7] : memref<1x128xf32, #tpu.memory_space<vmem>>, vector<1x128xf32>
    %c0_8 = arith.constant 0 : index
    %c0_9 = arith.constant 0 : index
    %5 = vector.load %arg7[%c0_8, %c0_9] : memref<1x128xf32, #tpu.memory_space<vmem>>, vector<1x128xf32>
    %c0_10 = arith.constant 0 : index
    %c0_11 = arith.constant 0 : index
    %6 = vector.load %arg9[%c0_10, %c0_11] : memref<1x128xf32, #tpu.memory_space<vmem>>, vector<1x128xf32>
    %c0_12 = arith.constant 0 : index
    %c0_13 = arith.constant 0 : index
    %7 = vector.load %arg11[%c0_12, %c0_13] : memref<1x128xf32, #tpu.memory_space<vmem>>, vector<1x128xf32>
    %8 = tpu.iota {dimensions = array<i32: 1>} : vector<1x128xi32>
    %c32_i32 = arith.constant 32 : i32
    %9 = vector.broadcast %c32_i32 : i32 to vector<1x128xi32>
    %10 = arith.cmpi slt, %8, %9 : vector<1x128xi32>
    %11 = arith.extui %10 : vector<1x128xi1> to vector<1x128xi32>
    %12 = arith.sitofp %11 : vector<1x128xi32> to vector<1x128xf32>
    %cst = arith.constant dense<0.000000e+00> : vector<32xf32>
    %13 = vector.multi_reduction <add>, %1, %cst [1] : vector<32x128xf32> to vector<32xf32>
    %14 = vector.shape_cast %13 : vector<32xf32> to vector<32x1xf32>
    %cst_14 = arith.constant 3.125000e-02 : f32
    %15 = vector.broadcast %cst_14 : f32 to vector<32x1xf32>
    %16 = arith.mulf %14, %15 : vector<32x1xf32>
    %17 = vector.broadcast %16 : vector<32x1xf32> to vector<32x128xf32>
    %18 = arith.subf %1, %17 : vector<32x128xf32>
    %19 = vector.broadcast %12 : vector<1x128xf32> to vector<32x128xf32>
    %20 = arith.mulf %18, %19 : vector<32x128xf32>
    %21 = arith.mulf %20, %20 : vector<32x128xf32>
    %cst_15 = arith.constant dense<0.000000e+00> : vector<32xf32>
    %22 = vector.multi_reduction <add>, %21, %cst_15 [1] : vector<32x128xf32> to vector<32xf32>
    %23 = vector.shape_cast %22 : vector<32xf32> to vector<32x1xf32>
    %cst_16 = arith.constant 3.125000e-02 : f32
    %24 = vector.broadcast %cst_16 : f32 to vector<32x1xf32>
    %25 = arith.mulf %23, %24 : vector<32x1xf32>
    %cst_17 = arith.constant 9.99999974E-6 : f32
    %26 = vector.broadcast %cst_17 : f32 to vector<32x1xf32>
    %27 = arith.addf %25, %26 : vector<32x1xf32>
    %28 = math.rsqrt %27 : vector<32x1xf32>
    %29 = vector.broadcast %28 : vector<32x1xf32> to vector<32x128xf32>
    %30 = arith.mulf %20, %29 : vector<32x128xf32>
    %31 = vector.broadcast %2 : vector<1x128xf32> to vector<32x128xf32>
    %32 = arith.mulf %30, %31 : vector<32x128xf32>
    %33 = vector.broadcast %3 : vector<1x128xf32> to vector<32x128xf32>
    %34 = arith.addf %32, %33 : vector<32x128xf32>
    %35 = arith.truncf %34 : vector<32x128xf32> to vector<32x128xbf16>
    %c0_18 = arith.constant 0 : index
    %c0_19 = arith.constant 0 : index
    %36 = vector.load %arg4[%c0_18, %c0_19] : memref<128x384xbf16, #tpu.memory_space<vmem>>, vector<128x384xbf16>
    %cst_20 = arith.constant dense<0.000000e+00> : vector<32x384xf32>
    %37 = tpu.matmul %35, %36, %cst_20 {dimension_numbers = #tpu.dot_dimension_numbers<[1], [0], [0], [1], [0, 0, 1, 1], [], []>} : vector<32x128xbf16>, vector<128x384xbf16>, vector<32x384xf32> -> vector<32x384xf32>
    %38 = vector.extract_strided_slice %37 {offsets = [0, 0], sizes = [32, 128], strides = [1, 1]} : vector<32x384xf32> to vector<32x128xf32>
    %39 = vector.shape_cast %38 : vector<32x128xf32> to vector<4x8x128xf32>
    %40 = arith.truncf %39 : vector<4x8x128xf32> to vector<4x8x128xbf16>
    %41 = vector.extract_strided_slice %37 {offsets = [0, 128], sizes = [32, 128], strides = [1, 1]} : vector<32x384xf32> to vector<32x128xf32>
    %42 = vector.shape_cast %41 : vector<32x128xf32> to vector<4x8x128xf32>
    %43 = arith.truncf %42 : vector<4x8x128xf32> to vector<4x8x128xbf16>
    %44 = vector.extract_strided_slice %37 {offsets = [0, 256], sizes = [32, 128], strides = [1, 1]} : vector<32x384xf32> to vector<32x128xf32>
    %45 = vector.shape_cast %44 : vector<32x128xf32> to vector<4x8x128xf32>
    %46 = arith.truncf %45 : vector<4x8x128xf32> to vector<4x8x128xbf16>
    "tpu.trace_start"() <{level = 10 : i32, message = "bqh,bkh->bqk"}> : () -> ()
    %cst_21 = arith.constant dense<0.000000e+00> : vector<4x8x8xf32>
    %47 = tpu.matmul %43, %40, %cst_21 {dimension_numbers = #tpu.dot_dimension_numbers<[2], [2], [1], [1], [0, 0, 0, 1, 1, 1], [0], [0]>} : vector<4x8x128xbf16>, vector<4x8x128xbf16>, vector<4x8x8xf32> -> vector<4x8x8xf32>
    "tpu.trace_stop"() : () -> ()
    %cst_22 = arith.constant dense<0xFF800000> : vector<4x8xf32>
    %48 = vector.multi_reduction <maximumf>, %47, %cst_22 [2] : vector<4x8x8xf32> to vector<4x8xf32>
    %49 = vector.shape_cast %48 : vector<4x8xf32> to vector<4x8x1xf32>
    %50 = vector.broadcast %49 : vector<4x8x1xf32> to vector<4x8x8xf32>
    %51 = arith.subf %47, %50 : vector<4x8x8xf32>
    %52 = math.exp %51 : vector<4x8x8xf32>
    %cst_23 = arith.constant dense<0.000000e+00> : vector<4x8xf32>
    %53 = vector.multi_reduction <add>, %52, %cst_23 [2] : vector<4x8x8xf32> to vector<4x8xf32>
    %54 = vector.shape_cast %53 : vector<4x8xf32> to vector<4x8x1xf32>
    %55 = tpu.reciprocal %54 {approx = true} : vector<4x8x1xf32> -> vector<4x8x1xf32>
    %56 = vector.broadcast %55 : vector<4x8x1xf32> to vector<4x8x8xf32>
    %57 = arith.mulf %52, %56 : vector<4x8x8xf32>
    %58 = arith.truncf %57 : vector<4x8x8xf32> to vector<4x8x8xbf16>
    "tpu.trace_start"() <{level = 10 : i32, message = "bqk,bkh->bqh"}> : () -> ()
    %cst_24 = arith.constant dense<0.000000e+00> : vector<4x8x128xf32>
    %59 = tpu.matmul %58, %46, %cst_24 {dimension_numbers = #tpu.dot_dimension_numbers<[2], [1], [1], [2], [0, 0, 0, 1, 1, 2], [0], [0]>} : vector<4x8x8xbf16>, vector<4x8x128xbf16>, vector<4x8x128xf32> -> vector<4x8x128xf32>
    "tpu.trace_stop"() : () -> ()
    %60 = vector.shape_cast %59 : vector<4x8x128xf32> to vector<32x128xf32>
    %61 = arith.truncf %60 : vector<32x128xf32> to vector<32x128xbf16>
    %c0_25 = arith.constant 0 : index
    %c0_26 = arith.constant 0 : index
    %62 = vector.load %arg5[%c0_25, %c0_26] : memref<128x128xbf16, #tpu.memory_space<vmem>>, vector<128x128xbf16>
    %cst_27 = arith.constant dense<0.000000e+00> : vector<32x128xf32>
    %63 = tpu.matmul %61, %62, %cst_27 {dimension_numbers = #tpu.dot_dimension_numbers<[1], [0], [0], [1], [0, 0, 1, 1], [], []>} : vector<32x128xbf16>, vector<128x128xbf16>, vector<32x128xf32> -> vector<32x128xf32>
    %64 = arith.addf %1, %63 : vector<32x128xf32>
    %cst_28 = arith.constant dense<0.000000e+00> : vector<32xf32>
    %65 = vector.multi_reduction <add>, %64, %cst_28 [1] : vector<32x128xf32> to vector<32xf32>
    %66 = vector.shape_cast %65 : vector<32xf32> to vector<32x1xf32>
    %cst_29 = arith.constant 3.125000e-02 : f32
    %67 = vector.broadcast %cst_29 : f32 to vector<32x1xf32>
    %68 = arith.mulf %66, %67 : vector<32x1xf32>
    %69 = vector.broadcast %68 : vector<32x1xf32> to vector<32x128xf32>
    %70 = arith.subf %64, %69 : vector<32x128xf32>
    %71 = vector.broadcast %12 : vector<1x128xf32> to vector<32x128xf32>
    %72 = arith.mulf %70, %71 : vector<32x128xf32>
    %73 = arith.mulf %72, %72 : vector<32x128xf32>
    %cst_30 = arith.constant dense<0.000000e+00> : vector<32xf32>
    %74 = vector.multi_reduction <add>, %73, %cst_30 [1] : vector<32x128xf32> to vector<32xf32>
    %75 = vector.shape_cast %74 : vector<32xf32> to vector<32x1xf32>
    %cst_31 = arith.constant 3.125000e-02 : f32
    %76 = vector.broadcast %cst_31 : f32 to vector<32x1xf32>
    %77 = arith.mulf %75, %76 : vector<32x1xf32>
    %cst_32 = arith.constant 9.99999974E-6 : f32
    %78 = vector.broadcast %cst_32 : f32 to vector<32x1xf32>
    %79 = arith.addf %77, %78 : vector<32x1xf32>
    %80 = math.rsqrt %79 : vector<32x1xf32>
    %81 = vector.broadcast %80 : vector<32x1xf32> to vector<32x128xf32>
    %82 = arith.mulf %72, %81 : vector<32x128xf32>
    %83 = vector.broadcast %4 : vector<1x128xf32> to vector<32x128xf32>
    %84 = arith.mulf %82, %83 : vector<32x128xf32>
    %85 = vector.broadcast %5 : vector<1x128xf32> to vector<32x128xf32>
    %86 = arith.addf %84, %85 : vector<32x128xf32>
    %87 = arith.truncf %86 : vector<32x128xf32> to vector<32x128xbf16>
    %c0_33 = arith.constant 0 : index
    %c0_34 = arith.constant 0 : index
    %88 = vector.load %arg8[%c0_33, %c0_34] : memref<128x128xbf16, #tpu.memory_space<vmem>>, vector<128x128xbf16>
    %cst_35 = arith.constant dense<0.000000e+00> : vector<32x128xf32>
    %89 = tpu.matmul %87, %88, %cst_35 {dimension_numbers = #tpu.dot_dimension_numbers<[1], [0], [0], [1], [0, 0, 1, 1], [], []>} : vector<32x128xbf16>, vector<128x128xbf16>, vector<32x128xf32> -> vector<32x128xf32>
    %90 = vector.broadcast %6 : vector<1x128xf32> to vector<32x128xf32>
    %91 = arith.addf %89, %90 : vector<32x128xf32>
    %cst_36 = arith.constant 0.000000e+00 : f32
    %92 = vector.broadcast %cst_36 : f32 to vector<32x128xf32>
    %93 = arith.maximumf %91, %92 : vector<32x128xf32>
    %94 = arith.truncf %93 : vector<32x128xf32> to vector<32x128xbf16>
    %c0_37 = arith.constant 0 : index
    %c0_38 = arith.constant 0 : index
    %95 = vector.load %arg10[%c0_37, %c0_38] : memref<128x128xbf16, #tpu.memory_space<vmem>>, vector<128x128xbf16>
    %cst_39 = arith.constant dense<0.000000e+00> : vector<32x128xf32>
    %96 = tpu.matmul %94, %95, %cst_39 {dimension_numbers = #tpu.dot_dimension_numbers<[1], [0], [0], [1], [0, 0, 1, 1], [], []>} : vector<32x128xbf16>, vector<128x128xbf16>, vector<32x128xf32> -> vector<32x128xf32>
    %97 = vector.broadcast %7 : vector<1x128xf32> to vector<32x128xf32>
    %98 = arith.addf %96, %97 : vector<32x128xf32>
    %99 = arith.addf %64, %98 : vector<32x128xf32>
    %100 = vector.shape_cast %99 : vector<32x128xf32> to vector<4x8x128xf32>
    %c0_40 = arith.constant 0 : index
    %c0_41 = arith.constant 0 : index
    %c0_42 = arith.constant 0 : index
    %101 = vector.load %arg12[%c0_40, %c0_41, %c0_42] : memref<4x8x128xf32, #tpu.memory_space<vmem>>, vector<4x8x128xf32>
    tpu.vector_store %arg12[%c0_40, %c0_41, %c0_42], %100 {strides = array<i32>} : memref<4x8x128xf32, #tpu.memory_space<vmem>>, vector<4x8x128xf32>,
    return
  }
  func.func @transform_0(%arg0: i32) -> (i32, i32, i32) {
    %c0_i32 = arith.constant 0 : i32
    %c0_i32_0 = arith.constant 0 : i32
    %c0_i32_1 = arith.constant 0 : i32
    return %arg0, %c0_i32, %c0_i32_0 : i32, i32, i32
  }
  func.func @transform_1(%arg0: i32) -> (i32, i32) {
    %c0_i32 = arith.constant 0 : i32
    %c0_i32_0 = arith.constant 0 : i32
    %c0_i32_1 = arith.constant 0 : i32
    return %c0_i32, %c0_i32_0 : i32, i32
  }
  func.func @transform_2(%arg0: i32) -> (i32, i32) {
    %c0_i32 = arith.constant 0 : i32
    %c0_i32_0 = arith.constant 0 : i32
    %c0_i32_1 = arith.constant 0 : i32
    return %c0_i32, %c0_i32_0 : i32, i32
  }
  func.func @transform_3(%arg0: i32) -> (i32, i32) {
    %c0_i32 = arith.constant 0 : i32
    %c0_i32_0 = arith.constant 0 : i32
    %c0_i32_1 = arith.constant 0 : i32
    return %c0_i32, %c0_i32_0 : i32, i32
  }
  func.func @transform_4(%arg0: i32) -> (i32, i32) {
    %c0_i32 = arith.constant 0 : i32
    %c0_i32_0 = arith.constant 0 : i32
    %c0_i32_1 = arith.constant 0 : i32
    return %c0_i32, %c0_i32_0 : i32, i32
  }
  func.func @transform_5(%arg0: i32) -> (i32, i32) {
    %c0_i32 = arith.constant 0 : i32
    %c0_i32_0 = arith.constant 0 : i32
    %c0_i32_1 = arith.constant 0 : i32
    return %c0_i32, %c0_i32_0 : i32, i32
  }
  func.func @transform_6(%arg0: i32) -> (i32, i32) {
    %c0_i32 = arith.constant 0 : i32
    %c0_i32_0 = arith.constant 0 : i32
    %c0_i32_1 = arith.constant 0 : i32
    return %c0_i32, %c0_i32_0 : i32, i32
  }
  func.func @transform_7(%arg0: i32) -> (i32, i32) {
    %c0_i32 = arith.constant 0 : i32
    %c0_i32_0 = arith.constant 0 : i32
    %c0_i32_1 = arith.constant 0 : i32
    return %c0_i32, %c0_i32_0 : i32, i32
  }
  func.func @transform_8(%arg0: i32) -> (i32, i32) {
    %c0_i32 = arith.constant 0 : i32
    %c0_i32_0 = arith.constant 0 : i32
    %c0_i32_1 = arith.constant 0 : i32
    return %c0_i32, %c0_i32_0 : i32, i32
  }
  func.func @transform_9(%arg0: i32) -> (i32, i32) {
    %c0_i32 = arith.constant 0 : i32
    %c0_i32_0 = arith.constant 0 : i32
    %c0_i32_1 = arith.constant 0 : i32
    return %c0_i32, %c0_i32_0 : i32, i32
  }
  func.func @transform_10(%arg0: i32) -> (i32, i32) {
    %c0_i32 = arith.constant 0 : i32
    %c0_i32_0 = arith.constant 0 : i32
    %c0_i32_1 = arith.constant 0 : i32
    return %c0_i32, %c0_i32_0 : i32, i32
  }
  func.func @transform_11(%arg0: i32) -> (i32, i32, i32) {
    %c0_i32 = arith.constant 0 : i32
    %c0_i32_0 = arith.constant 0 : i32
    %c0_i32_1 = arith.constant 0 : i32
    return %arg0, %c0_i32, %c0_i32_0 : i32, i32, i32
  }
}

</mosaic_0001>

<bundles_post_ra>
// kernel: tpu_custom_call.1
= control target key start
LH: loop header
LB: loop body
LE: loop exit
PB: predicated region body
PF: predicated region fallthrough
CT: control target
= control target key end

     0   :  { %16 = vsyncpa [#allocation3], 0  ;;  %s2124_s0 = inlined_call_operand.hbm [shape: f32[4,8,128], index: 0, kind: input, shape index: {}]   ;;  %s2125_s1 = inlined_call_operand.vmem [shape: f32[1,128], index: 1, kind: input, shape index: {}]   ;;  %s2126_s2 = inlined_call_operand.vmem [shape: f32[1,128], index: 2, kind: input, shape index: {}]   ;;  %s2127_s3 = inlined_call_operand.hbm [shape: bf16[128,384], index: 3, kind: input, shape index: {}]   ;;  %s2128_s4 = inlined_call_operand.hbm [shape: bf16[128,128], index: 4, kind: input, shape index: {}]   ;;  %s2129_s5 = inlined_call_operand.vmem [shape: f32[1,128], index: 5, kind: input, shape index: {}]   ;;  %s2130_s6 = inlined_call_operand.vmem [shape: f32[1,128], index: 6, kind: input, shape index: {}]   ;;  %s2131_s7 = inlined_call_operand.hbm [shape: bf16[128,128], index: 7, kind: input, shape index: {}]   ;;  %s2132_s8 = inlined_call_operand.vmem [shape: f32[1,128], index: 8, kind: input, shape index: {}]   ;;  %s2133_s9 = inlined_call_operand.hbm [shape: bf16[128,128], index: 9, kind: input, shape index: {}]   ;;  %s2134_s10 = inlined_call_operand.vmem [shape: f32[1,128], index: 10, kind: input, shape index: {}]   ;;  %s2135_s11 = inlined_call_operand.hbm [shape: f32[4,8,128], index: 11, kind: output, shape index: {}]  }
   0x1   :  { %17 = vsyncpa [#allocation6], 0 }
   0x2   :  { %18 = vsyncpa [#allocation9], 0 }
   0x3   :  { %19 = vsyncpa [#allocation4], 0  ;;  %s1807_s17 = smov [#allocation5]   ;;  %s1667_s21 = scalar_lea.hbm %s2127_s3, 3072 }
   0x4   :  { %s41_s18 = sshll.u32 %s1807_s17, 4  ;;  %p1668_p0 = scmp.ne.s32.totalorder %s2127_s3, %s1667_s21  ;;  %s42_s18 = int_to_ptr.vmem [resolvable:$true] %s41_s18 }
   0x5   :  { %p1671_p1 = scmp.lt.u32.totalorder %s1667_s21, %s2127_s3 }
   0x7   :  { %p1673_p2 = pnand %p1671_p1, %p1668_p0 }
   0x9   :  { %1676 = shalt.err (!%p1673_p2)
}
   0xa   :  { %s1677_s26 = scalar_lea.vmem %s42_s18, 3072  ;;  %p1682_p4 = scmp.lt.s32.totalorder %s42_s18, %s42_s18 }
   0xb   :  { %p1678_p3 = scmp.ne.s32.totalorder %s42_s18, %s1677_s26  ;;  %p1683_p5 = scmp.lt.s32.totalorder %s1677_s26, %s1677_s26 }
   0xd   :  { %p1684_p6 = por %p1683_p5, %p1682_p4 }
   0xf   :  { %p1685_p7 = pnand %p1684_p6, %p1678_p3 }
  0x11   :  { %1688 = shalt.err (!%p1685_p7)
}
  0x12   :  { %s1808_s27 = smov 192   ;;  %s1809_s28 = smov 12  }
  0x13   :  { %47 = dma.hbm_to_vmem [thread:$0]  %s2127_s3, 3072, %s42_s18, [#allocation6], %s1808_s27, %s1808_s27, %s1809_s28  }
  0x14   :  { %s1810_s12 = smov [#allocation8]   ;;  %s1811_s14 = smov [#allocation2]  }
  0x15   :  { %s69_s13 = sshll.u32 %s1810_s12, 4  ;;  %s25_s15 = sshll.u32 %s1811_s14, 4  ;;  %s70_s13 = int_to_ptr.vmem [resolvable:$true] %s69_s13  ;;  %s26_s15 = int_to_ptr.vmem [resolvable:$true] %s25_s15 }
  0x16   :  { %s1689_s19 = scalar_lea.hbm %s2131_s7, 1024 }
  0x17   :  { %p1690_p8 = scmp.ne.s32.totalorder %s2131_s7, %s1689_s19  ;;  %p1693_p9 = scmp.lt.u32.totalorder %s1689_s19, %s2131_s7 }
  0x19   :  { %p1695_p10 = pnand %p1693_p9, %p1690_p8 }
  0x1b   :  { %1698 = shalt.err (!%p1695_p10)
}
  0x1c   :  { %s1699_s3 = scalar_lea.vmem %s70_s13, 1024  ;;  %p1704_p12 = scmp.lt.s32.totalorder %s70_s13, %s70_s13 }
  0x1d   :  { %p1700_p11 = scmp.ne.s32.totalorder %s70_s13, %s1699_s3  ;;  %p1705_p13 = scmp.lt.s32.totalorder %s1699_s3, %s1699_s3 }
  0x1f   :  { %p1706_p0 = por %p1705_p13, %p1704_p12 }
  0x21   :  { %p1707_p1 = pnand %p1706_p0, %p1700_p11 }
  0x23   :  { %1710 = shalt.err (!%p1707_p1)
}
  0x24   :  { %s1812_s18 = smov 64   ;;  %s1813_s24 = smov 4  }
  0x25   :  { %75 = dma.hbm_to_vmem [thread:$0]  %s2131_s7, 1024, %s70_s13, [#allocation9], %s1812_s18, %s1812_s18, %s1813_s24  }
  0x26   :  { %s1711_s29 = scalar_lea.hbm %s2124_s0, 512 }
  0x27   :  { %p1712_p2 = scmp.ne.s32.totalorder %s2124_s0, %s1711_s29  ;;  %p1715_p3 = scmp.lt.u32.totalorder %s1711_s29, %s2124_s0 }
  0x29   :  { %p1717_p4 = pnand %p1715_p3, %p1712_p2 }
  0x2b   :  { %1720 = shalt.err (!%p1717_p4)
}
  0x2c   :  { %s1721_s17 = scalar_lea.vmem %s26_s15, 512  ;;  %p1726_p6 = scmp.lt.s32.totalorder %s26_s15, %s26_s15 }
  0x2d   :  { %p1722_p5 = scmp.ne.s32.totalorder %s26_s15, %s1721_s17  ;;  %p1727_p7 = scmp.lt.s32.totalorder %s1721_s17, %s1721_s17 }
  0x2f   :  { %p1728_p8 = por %p1727_p7, %p1726_p6 }
  0x31   :  { %p1729_p9 = pnand %p1728_p8, %p1722_p5 }
  0x33   :  { %1732 = shalt.err (!%p1729_p9)
}
  0x34   :  { %s1814_s7 = smov 128   ;;  %s1815_s13 = smov 8  }
  0x35   :  { %31 = dma.hbm_to_vmem [thread:$0]  %s2124_s0, 512, %s26_s15, [#allocation3], %s1814_s7, %s1814_s7, %s1815_s13  }
  0x36   :  { %s1816_s21 = smov [#allocation7]   ;;  %s1817_s23 = smov [#allocation10]  }
  0x37   :  { %s53_s22 = sshll.u32 %s1816_s21, 4  ;;  %s83_s3 = sshll.u32 %s1817_s23, 4  ;;  %s54_s22 = int_to_ptr.vmem [resolvable:$true] %s53_s22  ;;  %s84_s3 = int_to_ptr.vmem [resolvable:$true] %s83_s3 }
  0x38   :  { %s1733_s27 = scalar_lea.hbm %s2128_s4, 1024 }
  0x39   :  { %p1734_p10 = scmp.ne.s32.totalorder %s2128_s4, %s1733_s27  ;;  %p1737_p11 = scmp.lt.u32.totalorder %s1733_s27, %s2128_s4 }
  0x3b   :  { %p1739_p12 = pnand %p1737_p11, %p1734_p10 }
  0x3d   :  { %1742 = shalt.err (!%p1739_p12)
}
  0x3e   :  { %s1743_s0 = scalar_lea.vmem %s54_s22, 1024  ;;  %p1748_p0 = scmp.lt.s32.totalorder %s54_s22, %s54_s22 }
  0x3f   :  { %p1744_p13 = scmp.ne.s32.totalorder %s54_s22, %s1743_s0  ;;  %p1749_p1 = scmp.lt.s32.totalorder %s1743_s0, %s1743_s0 }
  0x41   :  { %p1750_p2 = por %p1749_p1, %p1748_p0 }
  0x43   :  { %p1751_p3 = pnand %p1750_p2, %p1744_p13 }
  0x45   :  { %1754 = shalt.err (!%p1751_p3)
}
  0x46   :  { %59 = dma.hbm_to_vmem [thread:$0]  %s2128_s4, 1024, %s54_s22, [#allocation6], %s1812_s18, %s1812_s18, %s1813_s24  }
  0x47   :  { %s1755_s19 = scalar_lea.hbm %s2133_s9, 1024 }
  0x48   :  { %p1756_p4 = scmp.ne.s32.totalorder %s2133_s9, %s1755_s19  ;;  %p1759_p5 = scmp.lt.u32.totalorder %s1755_s19, %s2133_s9 }
  0x4a   :  { %p1761_p6 = pnand %p1759_p5, %p1756_p4 }
  0x4c   :  { %1764 = shalt.err (!%p1761_p6)
}
  0x4d   :  { %s1765_s26 = scalar_lea.vmem %s84_s3, 1024  ;;  %p1770_p8 = scmp.lt.s32.totalorder %s84_s3, %s84_s3 }
  0x4e   :  { %p1766_p7 = scmp.ne.s32.totalorder %s84_s3, %s1765_s26  ;;  %p1771_p9 = scmp.lt.s32.totalorder %s1765_s26, %s1765_s26 }
  0x50   :  { %p1772_p10 = por %p1771_p9, %p1770_p8 }
  0x52   :  { %p1773_p11 = pnand %p1772_p10, %p1766_p7 }
  0x54   :  { %1776 = shalt.err (!%p1773_p11)
}
  0x55   :  { %89 = dma.hbm_to_vmem [thread:$0]  %s2133_s9, 1024, %s84_s3, [#allocation9], %s1812_s18, %s1812_s18, %s1813_s24  }
  0x56   :  { %1799 = dma.done.wait [#allocation3], 512  }
  0x57   :  { %1800 = vsyncadd [#allocation3], 4294966784 }
  0x58   :  { %1801 = dma.done.wait [#allocation6], 4096  }
  0x59   :  { %1802 = vsyncadd [#allocation6], 4294963200 }
  0x5a   :  { %1803 = dma.done.wait [#allocation9], 2048  }
  0x5b   :  { %1804 = vsyncadd [#allocation9], 4294965248  ;;  %v1954_v0 = vld [vmem:[#allocation2] sm:$0xff]  ;;  %v1956_v1 = vld [vmem:[#allocation2 + $0x10] sm:$0xff]  ;;  %v118_v8 = vlaneseq  ;;  %v1818_v14 = vmov 0.0   ;;  %v1819_v47 = vmov 0  }
  0x5c   :  { %v1958_v2 = vld [vmem:[#allocation2 + $0x8] sm:$0xff]  ;;  %123 = vadd.xlane.f32.xlu0 %v1954_v0  ;;  %127 = vadd.xlane.f32.xlu1 %v1956_v1  ;;  %v1962_v3 = vld [vmem:[#allocation2 + $0x18] sm:$0xff]  ;;  %v1579_v4 = vld [vmem:[#allocation5 + $0x4] ss:$12 sps:$4 sm:$0xff]   ;;  %vm1820_vm1 = vmmov 0   ;;  %vm679_vm2 = vcmask 1043456  }
  0x5d   :  { %v1581_v5 = vld [vmem:[#allocation5] ss:$12 sps:$4 sm:$0xff]   ;;  %v1582_v6 = vld [vmem:[#allocation5 + $0x1c] ss:$12 sps:$4 sm:$0xff]   ;;  %353 = vmatprep.subr.bf16.mxu0 %v1579_v4  ;;  %v119_v9 = vand.u32 127, %v118_v8  ;;  %385 = vmatprep.mubr.bf16.mxu0 %v1819_v47  ;;  %vm627_vm3 = vcmask 64512  }
  0x5e   :  { %v1584_v7 = vld [vmem:[#allocation5 + $0x8] ss:$12 sps:$4 sm:$0xff]   ;;  %354 = vmatpush1.bf16.msra.mxu0 %v1581_v5  ;;  %v1585_v32 = vld [vmem:[#allocation5 + $0x18] ss:$12 sps:$4 sm:$0xff]   ;;  %v1588_v34 = vld [vmem:[#allocation5 + $0x20] ss:$12 sps:$4 sm:$0xff]  }
  0x5f   :  { %1436 = vmatprep.subr.bf16.mxu1 %v1584_v7  ;;  %355 = vmatprep.subr.bf16.mxu0 %v1582_v6  ;;  %vm120_vm0 = vcmp.lt.s32.totalorder %v119_v9, 32  ;;  %v1586_v33 = vld [vmem:[#allocation5 + $0x34] ss:$12 sps:$4 sm:$0xff]   ;;  %v1589_v35 = vld [vmem:[#allocation5 + $0x30] ss:$12 sps:$4 sm:$0xff]  }
  0x60   :  { %125 = vadd.xlane.f32.xlu0 %v1958_v2  ;;  %129 = vadd.xlane.f32.xlu1 %v1962_v3  ;;  %v1967_v15 = vsel %vm120_vm0, 1.0, %v1818_v14  ;;  %v1590_v36 = vld [vmem:[#allocation5 + $0x4c] ss:$12 sps:$4 sm:$0xff]   ;;  %v1593_v38 = vld [vmem:[#allocation5 + $0x48] ss:$12 sps:$4 sm:$0xff]  }
  0x61   :  { %1437 = vmatpush3.bf16.msra.mxu1 %v1584_v7  ;;  %v1592_v37 = vld [vmem:[#allocation5 + $0x38] ss:$12 sps:$4 sm:$0xff]   ;;  %v1596_v40 = vld [vmem:[#allocation5 + $0x50] ss:$12 sps:$4 sm:$0xff]   ;;  %v1597_v41 = vld [vmem:[#allocation5 + $0x60] ss:$12 sps:$4 sm:$0xff]  }
  0x62   :  { %356 = vmatpush1.bf16.msra.mxu0 %v1585_v32  ;;  %1438 = vmatprep.subr.bf16.mxu1 %v1588_v34  ;;  %v1594_v39 = vld [vmem:[#allocation5 + $0x64] ss:$12 sps:$4 sm:$0xff]   ;;  %v1598_v42 = vld [vmem:[#allocation5 + $0x7c] ss:$12 sps:$4 sm:$0xff]   ;;  %v1602_v45 = vld [vmem:[#allocation5 + $0x94] ss:$12 sps:$4 sm:$0xff]  }
  0x63   :  { %357 = vmatprep.subr.bf16.mxu0 %v1586_v33  ;;  %v1600_v43 = vld [vmem:[#allocation5 + $0x68] ss:$12 sps:$4 sm:$0xff]   ;;  %v1601_v44 = vld [vmem:[#allocation5 + $0x78] ss:$12 sps:$4 sm:$0xff]   ;;  %v1604_v46 = vld [vmem:[#allocation5 + $0x80] ss:$12 sps:$4 sm:$0xff]  }
  0x64   :  { %v1605_v48 = vld [vmem:[#allocation5 + $0x90] ss:$12 sps:$4 sm:$0xff]   ;;  %v1606_v49 = vld [vmem:[#allocation5 + $0xac] ss:$12 sps:$4 sm:$0xff]   ;;  %v1609_v51 = vld [vmem:[#allocation5 + $0xa8] ss:$12 sps:$4 sm:$0xff]  }
  0x65   :  { %1439 = vmatpush3.bf16.msra.mxu1 %v1588_v34  ;;  %v1608_v50 = vld [vmem:[#allocation5 + $0x98] ss:$12 sps:$4 sm:$0xff]   ;;  %v1610_v52 = vld [vmem:[#allocation5 + $0xb0] ss:$12 sps:$4 sm:$0xff]   ;;  %v1322_v7 = vld [vmem:[%s2125_s1] ss:$0 sm:$0xff] }
  0x66   :  { %358 = vmatpush1.bf16.msra.mxu0 %v1589_v35  ;;  %1440 = vmatprep.subr.bf16.mxu1 %v1592_v37 }
  0x67   :  { %359 = vmatprep.subr.bf16.mxu0 %v1590_v36 }
  0x69   :  { %1441 = vmatpush3.bf16.msra.mxu1 %v1592_v37 }
  0x6a   :  { %360 = vmatpush1.bf16.msra.mxu0 %v1593_v38  ;;  %1442 = vmatprep.subr.bf16.mxu1 %v1596_v40 }
  0x6b   :  { %361 = vmatprep.subr.bf16.mxu0 %v1594_v39 }
  0x6d   :  { %1443 = vmatpush3.bf16.msra.mxu1 %v1596_v40 }
  0x6e   :  { %362 = vmatpush1.bf16.msra.mxu0 %v1597_v41  ;;  %1444 = vmatprep.subr.bf16.mxu1 %v1600_v43 }
  0x6f   :  { %363 = vmatprep.subr.bf16.mxu0 %v1598_v42 }
  0x71   :  { %1445 = vmatpush3.bf16.msra.mxu1 %v1600_v43 }
  0x72   :  { %364 = vmatpush1.bf16.msra.mxu0 %v1601_v44  ;;  %1446 = vmatprep.subr.bf16.mxu1 %v1604_v46 }
  0x73   :  { %365 = vmatprep.subr.bf16.mxu0 %v1602_v45 }
  0x75   :  { %1447 = vmatpush3.bf16.msra.mxu1 %v1604_v46 }
  0x76   :  { %366 = vmatpush1.bf16.msra.mxu0 %v1605_v48  ;;  %1448 = vmatprep.subr.bf16.mxu1 %v1608_v50 }
  0x77   :  { %367 = vmatprep.subr.bf16.mxu0 %v1606_v49 }
  0x79   :  { %1449 = vmatpush3.bf16.msra.mxu1 %v1608_v50 }
  0x7a   :  { %368 = vmatpush1.bf16.msra.mxu0 %v1609_v51  ;;  %1450 = vmatprep.subr.bf16.mxu1 %v1610_v52 }
  0x7b   :  { %1456 = vmatprep.subr.bf16.mxu0 %v1818_v14 }
  0x7d   :  { %1451 = vmatpush3.bf16.msra.mxu1 %v1610_v52 }
  0x7e   :  { %1468 = vmatprep.subr.bf16.mxu1 %v1818_v14 }
  0xe9   :  { %v124_v10 = vpop.xlane.xlu0 %123  ;;  %v128_v11 = vpop.xlane.xlu1 %127 }
  0xea   :  { %v131_v12 = vmul.f32 0.03125, %v124_v10  ;;  %v133_v13 = vmul.f32 0.03125, %v128_v11 }
  0xec   :  { %v135_v16 = vsub.f32 %v1954_v0, %v131_v12  ;;  %v137_v17 = vsub.f32 %v1956_v1, %v133_v13  ;;  %v1323_v12 = vld [vmem:[%s2126_s2] ss:$0 sm:$0xff] }
  0xed   :  { %v126_v18 = vpop.xlane.xlu0 %125  ;;  %v130_v19 = vpop.xlane.xlu1 %129 }
  0xee   :  { %v132_v20 = vmul.f32 0.03125, %v126_v18  ;;  %v134_v21 = vmul.f32 0.03125, %v130_v19  ;;  %v1972_v22 = vmul.f32 %v1967_v15, %v135_v16  ;;  %v1975_v23 = vmul.f32 %v1967_v15, %v137_v17 }
  0xf0   :  { %v136_v24 = vsub.f32 %v1958_v2, %v132_v20  ;;  %v138_v25 = vsub.f32 %v1962_v3, %v134_v21  ;;  %v143_v26 = vmul.f32 %v1972_v22, %v1972_v22  ;;  %v145_v27 = vmul.f32 %v1975_v23, %v1975_v23 }
  0xf2   :  { %147 = vadd.xlane.f32.xlu0 %v143_v26  ;;  %v1984_v28 = vmul.f32 %v1967_v15, %v136_v24  ;;  %v1987_v29 = vmul.f32 %v1967_v15, %v138_v25 }
  0xf4   :  { %v144_v30 = vmul.f32 %v1984_v28, %v1984_v28  ;;  %v146_v31 = vmul.f32 %v1987_v29, %v1987_v29 }
  0xf6   :  { %151 = vadd.xlane.f32.xlu0 %v145_v27  ;;  %149 = vadd.xlane.f32.xlu1 %v144_v30 }
  0xfa   :  { %153 = vadd.xlane.f32.xlu1 %v146_v31 }
 0x17f   :  { %v148_v53 = vpop.xlane.xlu0 %147 }
 0x180   :  { %v155_v54 = vmul.f32 0.03125, %v148_v53 }
 0x182   :  { %v159_v55 = vadd.f32 1e-05, %v155_v54 }
 0x183   :  { %v150_v56 = vpop.xlane.xlu1 %149  ;;  %v152_v57 = vpop.xlane.xlu0 %151 }
 0x184   :  { %1635 = vrsqrt.f32 %v159_v55  ;;  %v156_v58 = vmul.f32 0.03125, %v150_v56  ;;  %v157_v59 = vmul.f32 0.03125, %v152_v57 }
 0x186   :  { %v160_v60 = vadd.f32 1e-05, %v156_v58  ;;  %v161_v61 = vadd.f32 1e-05, %v157_v59 }
 0x187   :  { %v154_v62 = vpop.xlane.xlu1 %153 }
 0x188   :  { %1637 = vrsqrt.f32 %v160_v60  ;;  %v158_v63 = vmul.f32 0.03125, %v154_v62 }
 0x189   :  { %1639 = vrsqrt.f32 %v161_v61 }
 0x18a   :  { %v162_v4 = vadd.f32 1e-05, %v158_v63 }
 0x18c   :  { %1641 = vrsqrt.f32 %v162_v4 }
 0x18e   :  { %v1636_v5 = vpop.eup %1635 }
 0x18f   :  { %v167_v6 = vmul.f32 %v1636_v5, %v1972_v22 }
 0x191   :  { %v177_v11 = vmul.f32 %v1322_v7, %v167_v6 }
 0x192   :  { %v1638_v8 = vpop.eup %1637 }
 0x193   :  { %v1640_v9 = vpop.eup %1639  ;;  %v168_v10 = vmul.f32 %v1638_v8, %v1984_v28  ;;  %v187_v18 = vadd.f32 %v1323_v12, %v177_v11 }
 0x194   :  { %v169_v13 = vmul.f32 %v1640_v9, %v1975_v23 }
 0x195   :  { %v178_v16 = vmul.f32 %v1322_v7, %v168_v10 }
 0x196   :  { %v1642_v17 = vpop.eup %1641  ;;  %v179_v21 = vmul.f32 %v1322_v7, %v169_v13 }
 0x197   :  { %v188_v19 = vadd.f32 %v1323_v12, %v178_v16  ;;  %v170_v20 = vmul.f32 %v1642_v17, %v1987_v29 }
 0x198   :  { %v189_v25 = vadd.f32 %v1323_v12, %v179_v21 }
 0x199   :  { %v191_v22 = vpack.c.bf16 %v188_v19, %v187_v18  ;;  %v180_v24 = vmul.f32 %v1322_v7, %v170_v20 }
 0x19b   :  { %386 = vmatmul.mubr.bf16.vlgmr.msra.gmra.mrb[0].mxu0 %v191_v22  ;;  %1452 = vmatprep.mubr.bf16.mxu1 %v191_v22  ;;  %v190_v26 = vadd.f32 %v1323_v12, %v180_v24 }
 0x19c   :  { %395 = vmatprep.mubr.bf16.mxu0 %v1819_v47 }
 0x19d   :  { %v192_v27 = vpack.c.bf16 %v190_v26, %v189_v25 }
 0x19f   :  { %1453 = vmatmul.mubr.bf16.vlgmr.msra.gmra.mrb[0].mxu1 %v192_v27 }
 0x1a0   :  { %1470 = vmatprep.mubr.msk.bf16.mxu1 %vm1820_vm1, %v1818_v14 }
 0x1a3   :  { %396 = vmatmul.mubr.bf16.gmra.mrb[4].mxu0 %v192_v27 }
 0x1a4   :  { %1458 = vmatprep.mubr.msk.bf16.mxu0 %vm1820_vm1, %v1818_v14 }
 0x26e   :  { %v387_v23 = vpop.f32.mrb[0].mxu0 }
 0x26f   :  { %v455_v28 = vpack.c.bf16 %v387_v23, %v387_v23  ;;  %v389_v29 = vpop.f32.mrb[1].mxu0 }
 0x270   :  { %v391_v30 = vpop.f32.mrb[2].mxu0  ;;  %v459_v39 = vpack.c.bf16 %v389_v29, %v389_v29 }
 0x271   :  { %v393_v31 = vpop.f32.mrb[3].mxu0  ;;  %1457 = vmatpush3.bf16.xpose.msra.mxu0 %v455_v28  ;;  %v456_v41 = vpack.c.bf16 %v391_v30, %v391_v30 }
 0x272   :  { %v1454_v32 = vpop.f32.mrb[0].mxu1  ;;  %1462 = vmatprep.subr.bf16.mxu0 %v1818_v14  ;;  %v460_v48 = vpack.c.bf16 %v393_v31, %v393_v31 }
 0x273   :  { %v465_v33 = vpack.c.bf16 %v1454_v32, %v1454_v32  ;;  %v440_v34 = vpop.f32.mrb[1].mxu1 }
 0x274   :  { %v1455_v35 = vpop.f32.mrb[2].mxu1  ;;  %v463_v47 = vpack.c.bf16 %v440_v34, %v440_v34 }
 0x275   :  { %v2011_v36 = vsel %vm679_vm2, %v465_v33, 0  ;;  %v466_v37 = vpack.c.bf16 %v1455_v35, %v1455_v35  ;;  %v443_v38 = vpop.f32.mrb[3].mxu1 }
 0x276   :  { %v397_v40 = vpop.f32.mrb[4].mxu0  ;;  %v681_v51 = vsel %vm679_vm2, %v463_v47, 0  ;;  %v464_v52 = vpack.c.bf16 %v443_v38, %v443_v38 }
 0x277   :  { %v2014_v42 = vsel %vm679_vm2, %v466_v37, 0  ;;  %v457_v43 = vpack.c.bf16 %v397_v40, %v397_v40  ;;  %v399_v44 = vpop.f32.mrb[5].mxu0 }
 0x278   :  { %v401_v45 = vpop.f32.mrb[6].mxu0  ;;  %1459 = vmatmul.mubr.bf16.vlgmr.msra.gmra.mrb[8].mxu0 %v459_v39  ;;  %v461_v49 = vpack.c.bf16 %v399_v44, %v399_v44  ;;  %v727_v54 = vsel %vm679_vm2, %v464_v52, 0 }
 0x279   :  { %v403_v46 = vpop.f32.mrb[7].mxu0  ;;  %1463 = vmatpush3.bf16.xpose.msra.mxu0 %v456_v41  ;;  %1469 = vmatpush3.bf16.xpose.msra.mxu1 %v457_v43  ;;  %v458_v50 = vpack.c.bf16 %v401_v45, %v401_v45  ;;  %v1611_v45 = vld [vmem:[#allocation7] sm:$0xff]  }
 0x27a   :  { %1464 = vmatprep.mubr.msk.bf16.mxu0 %vm1820_vm1, %v1818_v14  ;;  %1474 = vmatprep.subr.bf16.mxu0 %v1818_v14  ;;  %v462_v53 = vpack.c.bf16 %v403_v46, %v403_v46 }
 0x27b   :  { %1480 = vmatprep.subr.bf16.mxu1 %v1818_v14 }
 0x280   :  { %1465 = vmatmul.mubr.bf16.vlgmr.msra.gmra.mrb[12].mxu0 %v460_v48  ;;  %1471 = vmatmul.mubr.bf16.vlgmr.msra.gmra.mrb[4].mxu1 %v461_v49 }
 0x281   :  { %1475 = vmatpush3.bf16.xpose.msra.mxu0 %v458_v50  ;;  %1481 = vmatpush3.bf16.msra.mxu1 %v681_v51 }
 0x282   :  { %1476 = vmatprep.mubr.msk.bf16.mxu0 %vm1820_vm1, %v1818_v14  ;;  %1486 = vmatprep.subr.bf16.mxu0 %v1818_v14 }
 0x283   :  { %1482 = vmatprep.mubr.msk.bf16.mxu1 %vm1820_vm1, %v1818_v14  ;;  %1492 = vmatprep.subr.bf16.mxu1 %v1818_v14 }
 0x288   :  { %1477 = vmatmul.mubr.bf16.vlgmr.msra.gmra.mrb[16].mxu0 %v462_v53  ;;  %v1612_v53 = vld [vmem:[#allocation7 + $0x8] sm:$0xff]  }
 0x289   :  { %1487 = vmatpush3.bf16.msra.mxu0 %v727_v54  ;;  %1488 = vmatprep.mubr.msk.bf16.mxu0 %vm1820_vm1, %v1818_v14 }
 0x28a   :  { %1498 = vmatprep.subr.bf16.mxu0 %v1818_v14 }
 0x34b   :  { %v501_v55 = vpop.f32.mrb[8].mxu0 }
 0x34c   :  { %v1460_v56 = vpop.f32.mrb[9].mxu0  ;;  %v628_v57 = vsel %vm627_vm3, %v501_v55, -inf }
 0x34d   :  { %629 = vmax.xlane.f32.xlu0 %v628_v57  ;;  %v504_v58 = vpop.f32.mrb[10].mxu0  ;;  %v1614_v57 = vld [vmem:[#allocation7 + $0x18] sm:$0xff]  }
 0x34e   :  { %v1461_v59 = vpop.f32.mrb[11].mxu0  ;;  %v1615_v58 = vld [vmem:[#allocation7 + $0x20] sm:$0xff]  }
 0x34f   :  { %v1616_v59 = vld [vmem:[#allocation7 + $0x28] sm:$0xff]  }
 0x353   :  { %v541_v60 = vpop.f32.mrb[12].mxu0  ;;  %v581_v61 = vpop.f32.mrb[4].mxu1 }
 0x354   :  { %v1466_v62 = vpop.f32.mrb[13].mxu0  ;;  %v1472_v63 = vpop.f32.mrb[5].mxu1  ;;  %v634_v4 = vsel %vm627_vm3, %v581_v61, -inf  ;;  %v631_v5 = vsel %vm627_vm3, %v541_v60, -inf }
 0x355   :  { %v584_v6 = vpop.f32.mrb[6].mxu1  ;;  %635 = vmax.xlane.f32.xlu0 %v634_v4  ;;  %632 = vmax.xlane.f32.xlu1 %v631_v5  ;;  %v544_v7 = vpop.f32.mrb[14].mxu0 }
 0x356   :  { %v1467_v8 = vpop.f32.mrb[15].mxu0  ;;  %v1473_v9 = vpop.f32.mrb[7].mxu1 }
 0x35b   :  { %v621_v10 = vpop.f32.mrb[16].mxu0 }
 0x35c   :  { %v1478_v11 = vpop.f32.mrb[17].mxu0  ;;  %v637_v12 = vsel %vm627_vm3, %v621_v10, -inf }
 0x35d   :  { %638 = vmax.xlane.f32.xlu1 %v637_v12  ;;  %v624_v13 = vpop.f32.mrb[18].mxu0 }
 0x35e   :  { %v1479_v16 = vpop.f32.mrb[19].mxu0 }
 0x3da   :  { %v630_v17 = vpop.xlane.xlu0 %629 }
 0x3db   :  { %v640_v18 = vsub.f32 %v501_v55, %v630_v17 }
 0x3dd   :  { %v644_v19 = vmul.f32 1.442695, %v640_v18 }
 0x3df   :  { %1643 = vpow2.f32 %v644_v19 }
 0x3e2   :  { %v636_v20 = vpop.xlane.xlu0 %635  ;;  %v633_v21 = vpop.xlane.xlu1 %632 }
 0x3e3   :  { %v642_v22 = vsub.f32 %v581_v61, %v636_v20  ;;  %v641_v24 = vsub.f32 %v541_v60, %v633_v21 }
 0x3e5   :  { %v648_v25 = vmul.f32 1.442695, %v642_v22  ;;  %v646_v26 = vmul.f32 1.442695, %v641_v24 }
 0x3e7   :  { %1645 = vpow2.f32 %v648_v25 }
 0x3e8   :  { %1647 = vpow2.f32 %v646_v26 }
 0x3e9   :  { %v1644_v27 = vpop.eup %1643 }
 0x3ea   :  { %v639_v23 = vpop.xlane.xlu1 %638  ;;  %v652_v28 = vsel %vm627_vm3, %v1644_v27, 0.0 }
 0x3eb   :  { %v643_v29 = vsub.f32 %v621_v10, %v639_v23  ;;  %653 = vadd.xlane.f32.xlu0 %v652_v28 }
 0x3ed   :  { %v650_v30 = vmul.f32 1.442695, %v643_v29 }
 0x3ef   :  { %1649 = vpow2.f32 %v650_v30 }
 0x3f1   :  { %v1646_v31 = vpop.eup %1645 }
 0x3f2   :  { %v1648_v32 = vpop.eup %1647  ;;  %v658_v33 = vsel %vm627_vm3, %v1646_v31, 0.0 }
 0x3f3   :  { %659 = vadd.xlane.f32.xlu0 %v658_v33  ;;  %v655_v34 = vsel %vm627_vm3, %v1648_v32, 0.0 }
 0x3f4   :  { %656 = vadd.xlane.f32.xlu1 %v655_v34 }
 0x3f9   :  { %v1650_v35 = vpop.eup %1649 }
 0x3fa   :  { %v661_v37 = vsel %vm627_vm3, %v1650_v35, 0.0 }
 0x3fb   :  { %662 = vadd.xlane.f32.xlu1 %v661_v37 }
 0x478   :  { %v654_v38 = vpop.xlane.xlu0 %653 }
 0x479   :  { %1651 = vrcp.f32 %v654_v38 }
 0x480   :  { %v660_v39 = vpop.xlane.xlu0 %659 }
 0x481   :  { %1653 = vrcp.f32 %v660_v39  ;;  %v657_v40 = vpop.xlane.xlu1 %656 }
 0x482   :  { %1655 = vrcp.f32 %v657_v40 }
 0x483   :  { %v1652_v41 = vpop.eup %1651 }
 0x484   :  { %v668_v43 = vmul.f32 %v1652_v41, %v1644_v27 }
 0x486   :  { %v672_v44 = vpack.c.bf16 %v668_v43, %v668_v43 }
 0x488   :  { %1483 = vmatmul.mubr.msk.bf16.vlgmr.msra.gmra.mrb[8].mxu1 %vm627_vm3, %v672_v44  ;;  %v663_v46 = vpop.xlane.xlu1 %662 }
 0x489   :  { %1493 = vmatpush3.bf16.msra.mxu1 %v2011_v36  ;;  %1657 = vrcp.f32 %v663_v46  ;;  %1494 = vmatprep.mubr.msk.bf16.mxu1 %vm1820_vm1, %v1818_v14  ;;  %v1613_v36 = vld [vmem:[#allocation7 + $0x10] sm:$0xff]  }
 0x48a   :  { %1504 = vmatprep.subr.bf16.mxu1 %v1611_v45 }
 0x48b   :  { %v1654_v47 = vpop.eup %1653 }
 0x48c   :  { %v1656_v48 = vpop.eup %1655  ;;  %v670_v49 = vmul.f32 %v1654_v47, %v1646_v31  ;;  %v1620_v47 = vld [vmem:[#allocation8 + $0x8] sm:$0xff]  }
 0x48d   :  { %v669_v50 = vmul.f32 %v1656_v48, %v1648_v32  ;;  %v1621_v48 = vld [vmem:[#allocation8 + $0x10] sm:$0xff]  }
 0x48e   :  { %v674_v51 = vpack.c.bf16 %v670_v49, %v670_v49  ;;  %v1622_v49 = vld [vmem:[#allocation8 + $0x18] sm:$0xff]  }
 0x48f   :  { %v673_v52 = vpack.c.bf16 %v669_v50, %v669_v50  ;;  %v1623_v50 = vld [vmem:[#allocation8 + $0x20] sm:$0xff]  }
 0x490   :  { %1495 = vmatmul.mubr.msk.bf16.vlgmr.msra.gmra.mrb[12].mxu1 %vm627_vm3, %v674_v51  ;;  %v1624_v51 = vld [vmem:[#allocation8 + $0x28] sm:$0xff]  }
 0x491   :  { %1489 = vmatmul.mubr.msk.bf16.vlgmr.msra.gmra.mrb[20].mxu0 %vm627_vm3, %v673_v52  ;;  %1505 = vmatpush3.bf16.msra.mxu1 %v1611_v45  ;;  %v1626_v52 = vld [vmem:[#allocation8 + $0x38] sm:$0xff]  }
 0x492   :  { %1499 = vmatpush3.bf16.msra.mxu0 %v2014_v42  ;;  %1500 = vmatprep.mubr.msk.bf16.mxu0 %vm1820_vm1, %v1818_v14  ;;  %v1617_v14 = vld [vmem:[#allocation7 + $0x30] sm:$0xff]   ;;  %v1618_v42 = vld [vmem:[#allocation7 + $0x38] sm:$0xff]  }
 0x493   :  { %v1658_v54 = vpop.eup %1657  ;;  %1506 = vmatprep.subr.bf16.mxu1 %v1612_v53 }
 0x494   :  { %v671_v55 = vmul.f32 %v1658_v54, %v1650_v35  ;;  %v1629_v54 = vld [vmem:[#allocation10 + $0x10] sm:$0xff]  }
 0x495   :  { %1507 = vmatpush3.bf16.msra.mxu1 %v1612_v53  ;;  %v1627_v53 = vld [vmem:[#allocation10] sm:$0xff]  }
 0x496   :  { %v675_v56 = vpack.c.bf16 %v671_v55, %v671_v55  ;;  %1508 = vmatprep.subr.bf16.mxu1 %v1613_v36  ;;  %v1630_v55 = vld [vmem:[#allocation10 + $0x18] sm:$0xff]  }
 0x499   :  { %1501 = vmatmul.mubr.msk.bf16.vlgmr.msra.gmra.mrb[24].mxu0 %vm627_vm3, %v675_v56  ;;  %1509 = vmatpush3.bf16.msra.mxu1 %v1613_v36  ;;  %v1628_v36 = vld [vmem:[#allocation10 + $0x8] sm:$0xff]   ;;  %v1631_v56 = vld [vmem:[#allocation10 + $0x20] sm:$0xff]  }
 0x49a   :  { %1510 = vmatprep.subr.bf16.mxu1 %v1614_v57 }
 0x49d   :  { %1511 = vmatpush3.bf16.msra.mxu1 %v1614_v57  ;;  %v1632_v57 = vld [vmem:[#allocation10 + $0x28] sm:$0xff]  }
 0x49e   :  { %1512 = vmatprep.subr.bf16.mxu1 %v1615_v58 }
 0x4a1   :  { %1513 = vmatpush3.bf16.msra.mxu1 %v1615_v58 }
 0x4a2   :  { %1514 = vmatprep.subr.bf16.mxu1 %v1616_v59 }
 0x4a5   :  { %1515 = vmatpush3.bf16.msra.mxu1 %v1616_v59 }
 0x4a6   :  { %1516 = vmatprep.subr.bf16.mxu1 %v1617_v14 }
 0x4a9   :  { %1517 = vmatpush3.bf16.msra.mxu1 %v1617_v14 }
 0x4aa   :  { %1518 = vmatprep.subr.bf16.mxu1 %v1618_v42 }
 0x4ad   :  { %1519 = vmatpush3.bf16.msra.mxu1 %v1618_v42 }
 0x4ae   :  { %1544 = vmatprep.subr.bf16.mxu1 %v1627_v53 }
 0x55b   :  { %v717_v60 = vpop.f32.mrb[8].mxu1 }
 0x55c   :  { %v1484_v61 = vpop.f32.mrb[9].mxu1 }
 0x55d   :  { %v720_v62 = vpop.f32.mrb[10].mxu1 }
 0x55e   :  { %v1485_v63 = vpop.f32.mrb[11].mxu1 }
 0x563   :  { %v809_v4 = vpop.f32.mrb[12].mxu1 }
 0x564   :  { %v763_v5 = vpop.f32.mrb[20].mxu0  ;;  %v1496_v6 = vpop.f32.mrb[13].mxu1 }
 0x565   :  { %v861_v7 = vpack.c.bf16 %v763_v5, %v717_v60  ;;  %v1490_v8 = vpop.f32.mrb[21].mxu0  ;;  %v812_v9 = vpop.f32.mrb[14].mxu1 }
 0x566   :  { %v766_v10 = vpop.f32.mrb[22].mxu0  ;;  %v1497_v11 = vpop.f32.mrb[15].mxu1  ;;  %v1360_v9 = vld [vmem:[%s2129_s5] ss:$0 sm:$0xff] }
 0x567   :  { %v1491_v12 = vpop.f32.mrb[23].mxu0  ;;  %1520 = vmatprep.mubr.bf16.mxu1 %v861_v7 }
 0x56c   :  { %v855_v13 = vpop.f32.mrb[24].mxu0 }
 0x56d   :  { %v862_v16 = vpack.c.bf16 %v855_v13, %v809_v4  ;;  %v1502_v17 = vpop.f32.mrb[25].mxu0 }
 0x56e   :  { %v858_v18 = vpop.f32.mrb[26].mxu0  ;;  %v1361_v17 = vld [vmem:[%s2130_s6] ss:$0 sm:$0xff] }
 0x56f   :  { %v1503_v19 = vpop.f32.mrb[27].mxu0  ;;  %1521 = vmatmul.mubr.bf16.vlgmr.msra.gmra.mrb[16].mxu1 %v862_v16 }
 0x570   :  { %1545 = vmatpush3.bf16.msra.mxu1 %v1627_v53 }
 0x571   :  { %1546 = vmatprep.subr.bf16.mxu1 %v1628_v36 }
 0x574   :  { %1547 = vmatpush3.bf16.msra.mxu1 %v1628_v36 }
 0x575   :  { %1548 = vmatprep.subr.bf16.mxu1 %v1629_v54 }
 0x578   :  { %1549 = vmatpush3.bf16.msra.mxu1 %v1629_v54 }
 0x579   :  { %1550 = vmatprep.subr.bf16.mxu1 %v1630_v55 }
 0x57c   :  { %1551 = vmatpush3.bf16.msra.mxu1 %v1630_v55 }
 0x57d   :  { %1552 = vmatprep.subr.bf16.mxu1 %v1631_v56 }
 0x580   :  { %1553 = vmatpush3.bf16.msra.mxu1 %v1631_v56 }
 0x581   :  { %1554 = vmatprep.subr.bf16.mxu1 %v1632_v57 }
 0x584   :  { %1555 = vmatpush3.bf16.msra.mxu1 %v1632_v57 }
 0x642   :  { %v1522_v20 = vpop.f32.mrb[16].mxu1 }
 0x643   :  { %v961_v21 = vpop.f32.mrb[17].mxu1  ;;  %v2057_v27 = vadd.f32 %v1522_v20, %v1956_v1 }
 0x644   :  { %v2050_v22 = vadd.f32 %v961_v21, %v1954_v0  ;;  %v1523_v24 = vpop.f32.mrb[18].mxu1  ;;  %v1619_v0 = vld [vmem:[#allocation8] sm:$0xff]  }
 0x645   :  { %v964_v25 = vpop.f32.mrb[19].mxu1  ;;  %v2061_v23 = vadd.f32 %v1523_v24, %v1962_v3  ;;  %1524 = vmatprep.subr.bf16.mxu0 %v1619_v0 }
 0x646   :  { %v2053_v26 = vadd.f32 %v964_v25, %v1958_v2  ;;  %980 = vadd.xlane.f32.xlu0 %v2050_v22  ;;  %1525 = vmatpush3.bf16.msra.mxu0 %v1619_v0 }
 0x647   :  { %1526 = vmatprep.subr.bf16.mxu0 %v1620_v47 }
 0x648   :  { %982 = vadd.xlane.f32.xlu1 %v2053_v26 }
 0x64a   :  { %984 = vadd.xlane.f32.xlu0 %v2057_v27  ;;  %1527 = vmatpush3.bf16.msra.mxu0 %v1620_v47 }
 0x64b   :  { %1528 = vmatprep.subr.bf16.mxu0 %v1621_v48 }
 0x64c   :  { %986 = vadd.xlane.f32.xlu1 %v2061_v23 }
 0x64e   :  { %1529 = vmatpush3.bf16.msra.mxu0 %v1621_v48 }
 0x64f   :  { %1530 = vmatprep.subr.bf16.mxu0 %v1622_v49 }
 0x652   :  { %1531 = vmatpush3.bf16.msra.mxu0 %v1622_v49  ;;  %v1371_v49 = vld [vmem:[%s2134_s10] ss:$0 sm:$0xff] }
 0x653   :  { %1532 = vmatprep.subr.bf16.mxu0 %v1623_v50 }
 0x656   :  { %1533 = vmatpush3.bf16.msra.mxu0 %v1623_v50 }
 0x657   :  { %1534 = vmatprep.subr.bf16.mxu0 %v1624_v51 }
 0x65a   :  { %1535 = vmatpush3.bf16.msra.mxu0 %v1624_v51 }
 0x6d3   :  { %v981_v28 = vpop.xlane.xlu0 %980 }
 0x6d4   :  { %v988_v2 = vmul.f32 0.03125, %v981_v28 }
 0x6d5   :  { %v983_v29 = vpop.xlane.xlu1 %982 }
 0x6d6   :  { %v992_v30 = vsub.f32 %v2050_v22, %v988_v2  ;;  %v989_v31 = vmul.f32 0.03125, %v983_v29 }
 0x6d7   :  { %v985_v1 = vpop.xlane.xlu0 %984 }
 0x6d8   :  { %v993_v32 = vsub.f32 %v2053_v26, %v989_v31  ;;  %v990_v33 = vmul.f32 0.03125, %v985_v1  ;;  %v2068_v3 = vmul.f32 %v1967_v15, %v992_v30  ;;  %v1633_v1 = vld [vmem:[#allocation10 + $0x30] sm:$0xff]  }
 0x6d9   :  { %v987_v34 = vpop.xlane.xlu1 %986  ;;  %1556 = vmatprep.subr.bf16.mxu1 %v1633_v1 }
 0x6da   :  { %v994_v35 = vsub.f32 %v2057_v27, %v990_v33  ;;  %v991_v37 = vmul.f32 0.03125, %v987_v34  ;;  %v1000_v38 = vmul.f32 %v2068_v3, %v2068_v3  ;;  %v2074_v39 = vmul.f32 %v1967_v15, %v993_v32  ;;  %1557 = vmatpush3.bf16.msra.mxu1 %v1633_v1  ;;  %v1634_v32 = vld [vmem:[#allocation10 + $0x38] sm:$0xff]   ;;  %v1362_v33 = vld [vmem:[%s2132_s8] ss:$0 sm:$0xff]  ;;  %s1821_s8 = smov [#allocation11]  }
 0x6db   :  { %1558 = vmatprep.subr.bf16.mxu1 %v1634_v32  ;;  %s1307_s12 = sshll.u32 %s1821_s8, 4  ;;  %s1308_s12 = int_to_ptr.vmem [resolvable:$true] %s1307_s12 }
 0x6dc   :  { %v995_v40 = vsub.f32 %v2061_v23, %v991_v37  ;;  %1004 = vadd.xlane.f32.xlu0 %v1000_v38  ;;  %v1001_v41 = vmul.f32 %v2074_v39, %v2074_v39  ;;  %v2080_v43 = vmul.f32 %v1967_v15, %v994_v35  ;;  %s1777_s10 = scalar_lea.vmem %s1308_s12, 512  ;;  %p1782_p13 = scmp.lt.s32.totalorder %s1308_s12, %s1308_s12 }
 0x6dd   :  { %p1778_p12 = scmp.ne.s32.totalorder %s1308_s12, %s1777_s10  ;;  %p1783_p0 = scmp.lt.s32.totalorder %s1777_s10, %s1777_s10 }
 0x6de   :  { %1006 = vadd.xlane.f32.xlu1 %v1001_v41  ;;  %v1002_v44 = vmul.f32 %v2080_v43, %v2080_v43  ;;  %v2085_v45 = vmul.f32 %v1967_v15, %v995_v40  ;;  %v1625_v15 = vld [vmem:[#allocation8 + $0x30] sm:$0xff]   ;;  %1559 = vmatpush3.bf16.msra.mxu1 %v1634_v32 }
 0x6df   :  { %1536 = vmatprep.subr.bf16.mxu0 %v1625_v15  ;;  %p1784_p1 = por %p1783_p0, %p1782_p13 }
 0x6e0   :  { %1008 = vadd.xlane.f32.xlu0 %v1002_v44  ;;  %v1003_v46 = vmul.f32 %v2085_v45, %v2085_v45  ;;  %1537 = vmatpush3.bf16.msra.mxu0 %v1625_v15 }
 0x6e1   :  { %1538 = vmatprep.subr.bf16.mxu0 %v1626_v52  ;;  %p1785_p2 = pnand %p1784_p1, %p1778_p12 }
 0x6e2   :  { %1010 = vadd.xlane.f32.xlu1 %v1003_v46 }
 0x6e4   :  { %1539 = vmatpush3.bf16.msra.mxu0 %v1626_v52 }
 0x769   :  { %v1005_v58 = vpop.xlane.xlu0 %1004 }
 0x76a   :  { %v1012_v59 = vmul.f32 0.03125, %v1005_v58 }
 0x76b   :  { %v1007_v14 = vpop.xlane.xlu1 %1006 }
 0x76c   :  { %v1016_v42 = vadd.f32 1e-05, %v1012_v59  ;;  %v1013_v60 = vmul.f32 0.03125, %v1007_v14 }
 0x76d   :  { %v1009_v61 = vpop.xlane.xlu0 %1008 }
 0x76e   :  { %1659 = vrsqrt.f32 %v1016_v42  ;;  %v1017_v62 = vadd.f32 1e-05, %v1013_v60  ;;  %v1014_v63 = vmul.f32 0.03125, %v1009_v61 }
 0x76f   :  { %v1011_v4 = vpop.xlane.xlu1 %1010 }
 0x770   :  { %1661 = vrsqrt.f32 %v1017_v62  ;;  %v1018_v5 = vadd.f32 1e-05, %v1014_v63  ;;  %v1015_v6 = vmul.f32 0.03125, %v1011_v4 }
 0x772   :  { %1663 = vrsqrt.f32 %v1018_v5  ;;  %v1019_v7 = vadd.f32 1e-05, %v1015_v6 }
 0x774   :  { %1665 = vrsqrt.f32 %v1019_v7 }
 0x778   :  { %v1660_v8 = vpop.eup %1659 }
 0x779   :  { %v1024_v10 = vmul.f32 %v1660_v8, %v2068_v3 }
 0x77a   :  { %v1662_v11 = vpop.eup %1661 }
 0x77b   :  { %v1025_v12 = vmul.f32 %v1662_v11, %v2074_v39  ;;  %v1034_v13 = vmul.f32 %v1360_v9, %v1024_v10 }
 0x77c   :  { %v1664_v16 = vpop.eup %1663 }
 0x77d   :  { %v1026_v18 = vmul.f32 %v1664_v16, %v2080_v43  ;;  %v1035_v19 = vmul.f32 %v1360_v9, %v1025_v12  ;;  %v1044_v24 = vadd.f32 %v1361_v17, %v1034_v13 }
 0x77e   :  { %v1666_v20 = vpop.eup %1665 }
 0x77f   :  { %v1027_v21 = vmul.f32 %v1666_v20, %v2085_v45  ;;  %v1045_v25 = vadd.f32 %v1361_v17, %v1035_v19  ;;  %v1036_v0 = vmul.f32 %v1360_v9, %v1026_v18 }
 0x781   :  { %v1048_v28 = vpack.c.bf16 %v1045_v25, %v1044_v24  ;;  %v1037_v2 = vmul.f32 %v1360_v9, %v1027_v21  ;;  %v1046_v29 = vadd.f32 %v1361_v17, %v1036_v0 }
 0x783   :  { %1540 = vmatprep.mubr.bf16.mxu0 %v1048_v28  ;;  %v1047_v30 = vadd.f32 %v1361_v17, %v1037_v2 }
 0x785   :  { %v1049_v31 = vpack.c.bf16 %v1047_v30, %v1046_v29 }
 0x787   :  { %1541 = vmatmul.mubr.bf16.vlgmr.msra.gmra.mrb[28].mxu0 %v1049_v31 }
 0x85a   :  { %v1542_v3 = vpop.f32.mrb[28].mxu0 }
 0x85b   :  { %v1163_v34 = vadd.f32 %v1542_v3, %v1362_v33  ;;  %v1154_v35 = vpop.f32.mrb[29].mxu0 }
 0x85c   :  { %v1155_v37 = vadd.f32 %v1362_v33, %v1154_v35  ;;  %v1543_v38 = vpop.f32.mrb[30].mxu0 }
 0x85d   :  { %v1166_v39 = vadd.f32 %v1543_v38, %v1362_v33  ;;  %v1157_v40 = vpop.f32.mrb[31].mxu0  ;;  %v1171_v43 = vmax.f32 %v1163_v34, 0.0 }
 0x85e   :  { %v1158_v41 = vadd.f32 %v1362_v33, %v1157_v40  ;;  %v1169_v45 = vmax.f32 %v1155_v37, 0.0 }
 0x85f   :  { %v1172_v44 = vmax.f32 %v1166_v39, 0.0 }
 0x860   :  { %v1170_v46 = vmax.f32 %v1158_v41, 0.0 }
 0x861   :  { %v1174_v47 = vpack.c.bf16 %v1172_v44, %v1171_v43 }
 0x862   :  { %v1173_v48 = vpack.c.bf16 %v1170_v46, %v1169_v45 }
 0x864   :  { %1560 = vmatprep.mubr.bf16.mxu1 %v1173_v48 }
 0x865   :  { %1561 = vmatmul.mubr.bf16.vlgmr.msra.gmra.mrb[20].mxu1 %v1174_v47 }
 0x938   :  { %v1562_v50 = vpop.f32.mrb[20].mxu1 }
 0x939   :  { %v1288_v51 = vadd.f32 %v1562_v50, %v1371_v49  ;;  %v1279_v15 = vpop.f32.mrb[21].mxu1 }
 0x93a   :  { %v1280_v52 = vadd.f32 %v1371_v49, %v1279_v15  ;;  %v1563_v53 = vpop.f32.mrb[22].mxu1 }
 0x93b   :  { %v1296_v36 = vadd.f32 %v1288_v51, %v2057_v27  ;;  %v1291_v54 = vadd.f32 %v1563_v53, %v1371_v49  ;;  %v1282_v55 = vpop.f32.mrb[23].mxu1 }
 0x93c   :  { %v1294_v56 = vadd.f32 %v1280_v52, %v2050_v22  ;;  %v1283_v57 = vadd.f32 %v1371_v49, %v1282_v55 }
 0x93d   :  { %1300 = vst [vmem:[#allocation11 + $0x10] sm:$0xff] %v1296_v36  ;;  %v1297_v58 = vadd.f32 %v1291_v54, %v2061_v23 }
 0x93e   :  { %1298 = vst [vmem:[#allocation11] sm:$0xff] %v1294_v56  ;;  %v1295_v59 = vadd.f32 %v1283_v57, %v2053_v26 }
 0x93f   :  { %1301 = vst [vmem:[#allocation11 + $0x18] sm:$0xff] %v1297_v58 }
 0x940   :  { %1299 = vst [vmem:[#allocation11 + $0x8] sm:$0xff] %v1295_v59 }
 0x941   :  { %1788 = shalt.err (!%p1785_p2)
}
 0x942   :  { %s1789_s14 = scalar_lea.hbm %s2135_s11, 512 }
 0x943   :  { %p1790_p3 = scmp.ne.s32.totalorder %s2135_s11, %s1789_s14  ;;  %p1793_p4 = scmp.lt.u32.totalorder %s1789_s14, %s2135_s11 }
 0x945   :  { %p1795_p5 = pnand %p1793_p4, %p1790_p3 }
 0x947   :  { %1798 = shalt.err (!%p1795_p5)
}
 0x948   :  { %1313 = dma.vmem_to_hbm [thread:$0]  %s1308_s12, 512, %s2135_s11, [#allocation4], %s1814_s7, %s1814_s7, %s1815_s13  }
 0x949   :  { %1805 = dma.done.wait [#allocation4], 512  }
 0x94a   :  { %1806 = vsyncadd [#allocation4], 4294966784 }
 0x94b   :  { %1317 = vsyncpa [#allocation3], 1 }
 0x94c   :  { %1318 = vsyncpa [#allocation6], 1 }
 0x94d   :  { %1319 = vsyncpa [#allocation9], 1 }
 0x94e   :  { %1320 = vsyncpa [#allocation4], 1 }

// kernel: tpu_custom_call.1
= control target key start
LH: loop header
LB: loop body
LE: loop exit
PB: predicated region body
PF: predicated region fallthrough
CT: control target
= control target key end

     0   :  { %16 = vsyncpa [#allocation3], 0  ;;  %s2124_s0 = inlined_call_operand.hbm [shape: f32[4,8,128], index: 0, kind: input, shape index: {}]   ;;  %s2125_s1 = inlined_call_operand.vmem [shape: f32[1,128], index: 1, kind: input, shape index: {}]   ;;  %s2126_s2 = inlined_call_operand.vmem [shape: f32[1,128], index: 2, kind: input, shape index: {}]   ;;  %s2127_s3 = inlined_call_operand.hbm [shape: bf16[128,384], index: 3, kind: input, shape index: {}]   ;;  %s2128_s4 = inlined_call_operand.hbm [shape: bf16[128,128], index: 4, kind: input, shape index: {}]   ;;  %s2129_s5 = inlined_call_operand.vmem [shape: f32[1,128], index: 5, kind: input, shape index: {}]   ;;  %s2130_s6 = inlined_call_operand.vmem [shape: f32[1,128], index: 6, kind: input, shape index: {}]   ;;  %s2131_s7 = inlined_call_operand.hbm [shape: bf16[128,128], index: 7, kind: input, shape index: {}]   ;;  %s2132_s8 = inlined_call_operand.vmem [shape: f32[1,128], index: 8, kind: input, shape index: {}]   ;;  %s2133_s9 = inlined_call_operand.hbm [shape: bf16[128,128], index: 9, kind: input, shape index: {}]   ;;  %s2134_s10 = inlined_call_operand.vmem [shape: f32[1,128], index: 10, kind: input, shape index: {}]   ;;  %s2135_s11 = inlined_call_operand.hbm [shape: f32[4,8,128], index: 11, kind: output, shape index: {}]  }
   0x1   :  { %17 = vsyncpa [#allocation6], 0 }
   0x2   :  { %18 = vsyncpa [#allocation9], 0 }
   0x3   :  { %19 = vsyncpa [#allocation4], 0  ;;  %s1807_s17 = smov [#allocation5]   ;;  %s1667_s21 = scalar_lea.hbm %s2127_s3, 3072 }
   0x4   :  { %s41_s18 = sshll.u32 %s1807_s17, 4  ;;  %p1668_p0 = scmp.ne.s32.totalorder %s2127_s3, %s1667_s21  ;;  %s42_s18 = int_to_ptr.vmem [resolvable:$true] %s41_s18 }
   0x5   :  { %p1671_p1 = scmp.lt.u32.totalorder %s1667_s21, %s2127_s3 }
   0x7   :  { %p1673_p2 = pnand %p1671_p1, %p1668_p0 }
   0x9   :  { %1676 = shalt.err (!%p1673_p2)
}
   0xa   :  { %s1677_s26 = scalar_lea.vmem %s42_s18, 3072  ;;  %p1682_p4 = scmp.lt.s32.totalorder %s42_s18, %s42_s18 }
   0xb   :  { %p1678_p3 = scmp.ne.s32.totalorder %s42_s18, %s1677_s26  ;;  %p1683_p5 = scmp.lt.s32.totalorder %s1677_s26, %s1677_s26 }
   0xd   :  { %p1684_p6 = por %p1683_p5, %p1682_p4 }
   0xf   :  { %p1685_p7 = pnand %p1684_p6, %p1678_p3 }
  0x11   :  { %1688 = shalt.err (!%p1685_p7)
}
  0x12   :  { %s1808_s27 = smov 192   ;;  %s1809_s28 = smov 12  }
  0x13   :  { %47 = dma.hbm_to_vmem [thread:$0]  %s2127_s3, 3072, %s42_s18, [#allocation6], %s1808_s27, %s1808_s27, %s1809_s28  }
  0x14   :  { %s1810_s12 = smov [#allocation8]   ;;  %s1811_s14 = smov [#allocation2]  }
  0x15   :  { %s69_s13 = sshll.u32 %s1810_s12, 4  ;;  %s25_s15 = sshll.u32 %s1811_s14, 4  ;;  %s70_s13 = int_to_ptr.vmem [resolvable:$true] %s69_s13  ;;  %s26_s15 = int_to_ptr.vmem [resolvable:$true] %s25_s15 }
  0x16   :  { %s1689_s19 = scalar_lea.hbm %s2131_s7, 1024 }
  0x17   :  { %p1690_p8 = scmp.ne.s32.totalorder %s2131_s7, %s1689_s19  ;;  %p1693_p9 = scmp.lt.u32.totalorder %s1689_s19, %s2131_s7 }
  0x19   :  { %p1695_p10 = pnand %p1693_p9, %p1690_p8 }
  0x1b   :  { %1698 = shalt.err (!%p1695_p10)
}
  0x1c   :  { %s1699_s3 = scalar_lea.vmem %s70_s13, 1024  ;;  %p1704_p12 = scmp.lt.s32.totalorder %s70_s13, %s70_s13 }
  0x1d   :  { %p1700_p11 = scmp.ne.s32.totalorder %s70_s13, %s1699_s3  ;;  %p1705_p13 = scmp.lt.s32.totalorder %s1699_s3, %s1699_s3 }
  0x1f   :  { %p1706_p0 = por %p1705_p13, %p1704_p12 }
  0x21   :  { %p1707_p1 = pnand %p1706_p0, %p1700_p11 }
  0x23   :  { %1710 = shalt.err (!%p1707_p1)
}
  0x24   :  { %s1812_s18 = smov 64   ;;  %s1813_s24 = smov 4  }
  0x25   :  { %75 = dma.hbm_to_vmem [thread:$0]  %s2131_s7, 1024, %s70_s13, [#allocation9], %s1812_s18, %s1812_s18, %s1813_s24  }
  0x26   :  { %s1711_s29 = scalar_lea.hbm %s2124_s0, 512 }
  0x27   :  { %p1712_p2 = scmp.ne.s32.totalorder %s2124_s0, %s1711_s29  ;;  %p1715_p3 = scmp.lt.u32.totalorder %s1711_s29, %s2124_s0 }
  0x29   :  { %p1717_p4 = pnand %p1715_p3, %p1712_p2 }
  0x2b   :  { %1720 = shalt.err (!%p1717_p4)
}
  0x2c   :  { %s1721_s17 = scalar_lea.vmem %s26_s15, 512  ;;  %p1726_p6 = scmp.lt.s32.totalorder %s26_s15, %s26_s15 }
  0x2d   :  { %p1722_p5 = scmp.ne.s32.totalorder %s26_s15, %s1721_s17  ;;  %p1727_p7 = scmp.lt.s32.totalorder %s1721_s17, %s1721_s17 }
  0x2f   :  { %p1728_p8 = por %p1727_p7, %p1726_p6 }
  0x31   :  { %p1729_p9 = pnand %p1728_p8, %p1722_p5 }
  0x33   :  { %1732 = shalt.err (!%p1729_p9)
}
  0x34   :  { %s1814_s7 = smov 128   ;;  %s1815_s13 = smov 8  }
  0x35   :  { %31 = dma.hbm_to_vmem [thread:$0]  %s2124_s0, 512, %s26_s15, [#allocation3], %s1814_s7, %s1814_s7, %s1815_s13  }
  0x36   :  { %s1816_s21 = smov [#allocation7]   ;;  %s1817_s23 = smov [#allocation10]  }
  0x37   :  { %s53_s22 = sshll.u32 %s1816_s21, 4  ;;  %s83_s3 = sshll.u32 %s1817_s23, 4  ;;  %s54_s22 = int_to_ptr.vmem [resolvable:$true] %s53_s22  ;;  %s84_s3 = int_to_ptr.vmem [resolvable:$true] %s83_s3 }
  0x38   :  { %s1733_s27 = scalar_lea.hbm %s2128_s4, 1024 }
  0x39   :  { %p1734_p10 = scmp.ne.s32.totalorder %s2128_s4, %s1733_s27  ;;  %p1737_p11 = scmp.lt.u32.totalorder %s1733_s27, %s2128_s4 }
  0x3b   :  { %p1739_p12 = pnand %p1737_p11, %p1734_p10 }
  0x3d   :  { %1742 = shalt.err (!%p1739_p12)
}
  0x3e   :  { %s1743_s0 = scalar_lea.vmem %s54_s22, 1024  ;;  %p1748_p0 = scmp.lt.s32.totalorder %s54_s22, %s54_s22 }
  0x3f   :  { %p1744_p13 = scmp.ne.s32.totalorder %s54_s22, %s1743_s0  ;;  %p1749_p1 = scmp.lt.s32.totalorder %s1743_s0, %s1743_s0 }
  0x41   :  { %p1750_p2 = por %p1749_p1, %p1748_p0 }
  0x43   :  { %p1751_p3 = pnand %p1750_p2, %p1744_p13 }
  0x45   :  { %1754 = shalt.err (!%p1751_p3)
}
  0x46   :  { %59 = dma.hbm_to_vmem [thread:$0]  %s2128_s4, 1024, %s54_s22, [#allocation6], %s1812_s18, %s1812_s18, %s1813_s24  }
  0x47   :  { %s1755_s19 = scalar_lea.hbm %s2133_s9, 1024 }
  0x48   :  { %p1756_p4 = scmp.ne.s32.totalorder %s2133_s9, %s1755_s19  ;;  %p1759_p5 = scmp.lt.u32.totalorder %s1755_s19, %s2133_s9 }
  0x4a   :  { %p1761_p6 = pnand %p1759_p5, %p1756_p4 }
  0x4c   :  { %1764 = shalt.err (!%p1761_p6)
}
  0x4d   :  { %s1765_s26 = scalar_lea.vmem %s84_s3, 1024  ;;  %p1770_p8 = scmp.lt.s32.totalorder %s84_s3, %s84_s3 }
  0x4e   :  { %p1766_p7 = scmp.ne.s32.totalorder %s84_s3, %s1765_s26  ;;  %p1771_p9 = scmp.lt.s32.totalorder %s1765_s26, %s1765_s26 }
  0x50   :  { %p1772_p10 = por %p1771_p9, %p1770_p8 }
  0x52   :  { %p1773_p11 = pnand %p1772_p10, %p1766_p7 }
  0x54   :  { %1776 = shalt.err (!%p1773_p11)
}
  0x55   :  { %89 = dma.hbm_to_vmem [thread:$0]  %s2133_s9, 1024, %s84_s3, [#allocation9], %s1812_s18, %s1812_s18, %s1813_s24  }
  0x56   :  { %1799 = dma.done.wait [#allocation3], 512  }
  0x57   :  { %1800 = vsyncadd [#allocation3], 4294966784 }
  0x58   :  { %1801 = dma.done.wait [#allocation6], 4096  }
  0x59   :  { %1802 = vsyncadd [#allocation6], 4294963200 }
  0x5a   :  { %1803 = dma.done.wait [#allocation9], 2048  }
  0x5b   :  { %1804 = vsyncadd [#allocation9], 4294965248  ;;  %v1954_v0 = vld [vmem:[#allocation2] sm:$0xff]  ;;  %v1956_v1 = vld [vmem:[#allocation2 + $0x10] sm:$0xff]  ;;  %v118_v8 = vlaneseq  ;;  %v1818_v14 = vmov 0.0   ;;  %v1819_v47 = vmov 0  }
  0x5c   :  { %v1958_v2 = vld [vmem:[#allocation2 + $0x8] sm:$0xff]  ;;  %123 = vadd.xlane.f32.xlu0 %v1954_v0  ;;  %127 = vadd.xlane.f32.xlu1 %v1956_v1  ;;  %v1962_v3 = vld [vmem:[#allocation2 + $0x18] sm:$0xff]  ;;  %v1579_v4 = vld [vmem:[#allocation5 + $0x4] ss:$12 sps:$4 sm:$0xff]   ;;  %vm1820_vm1 = vmmov 0   ;;  %vm679_vm2 = vcmask 1043456  }
  0x5d   :  { %v1581_v5 = vld [vmem:[#allocation5] ss:$12 sps:$4 sm:$0xff]   ;;  %v1582_v6 = vld [vmem:[#allocation5 + $0x1c] ss:$12 sps:$4 sm:$0xff]   ;;  %353 = vmatprep.subr.bf16.mxu0 %v1579_v4  ;;  %v119_v9 = vand.u32 127, %v118_v8  ;;  %385 = vmatprep.mubr.bf16.mxu0 %v1819_v47  ;;  %vm627_vm3 = vcmask 64512  }
  0x5e   :  { %v1584_v7 = vld [vmem:[#allocation5 + $0x8] ss:$12 sps:$4 sm:$0xff]   ;;  %354 = vmatpush1.bf16.msra.mxu0 %v1581_v5  ;;  %v1585_v32 = vld [vmem:[#allocation5 + $0x18] ss:$12 sps:$4 sm:$0xff]   ;;  %v1588_v34 = vld [vmem:[#allocation5 + $0x20] ss:$12 sps:$4 sm:$0xff]  }
  0x5f   :  { %1436 = vmatprep.subr.bf16.mxu1 %v1584_v7  ;;  %355 = vmatprep.subr.bf16.mxu0 %v1582_v6  ;;  %vm120_vm0 = vcmp.lt.s32.totalorder %v119_v9, 32  ;;  %v1586_v33 = vld [vmem:[#allocation5 + $0x34] ss:$12 sps:$4 sm:$0xff]   ;;  %v1589_v35 = vld [vmem:[#allocation5 + $0x30] ss:$12 sps:$4 sm:$0xff]  }
  0x60   :  { %125 = vadd.xlane.f32.xlu0 %v1958_v2  ;;  %129 = vadd.xlane.f32.xlu1 %v1962_v3  ;;  %v1967_v15 = vsel %vm120_vm0, 1.0, %v1818_v14  ;;  %v1590_v36 = vld [vmem:[#allocation5 + $0x4c] ss:$12 sps:$4 sm:$0xff]   ;;  %v1593_v38 = vld [vmem:[#allocation5 + $0x48] ss:$12 sps:$4 sm:$0xff]  }
  0x61   :  { %1437 = vmatpush3.bf16.msra.mxu1 %v1584_v7  ;;  %v1592_v37 = vld [vmem:[#allocation5 + $0x38] ss:$12 sps:$4 sm:$0xff]   ;;  %v1596_v40 = vld [vmem:[#allocation5 + $0x50] ss:$12 sps:$4 sm:$0xff]   ;;  %v1597_v41 = vld [vmem:[#allocation5 + $0x60] ss:$12 sps:$4 sm:$0xff]  }
  0x62   :  { %356 = vmatpush1.bf16.msra.mxu0 %v1585_v32  ;;  %1438 = vmatprep.subr.bf16.mxu1 %v1588_v34  ;;  %v1594_v39 = vld [vmem:[#allocation5 + $0x64] ss:$12 sps:$4 sm:$0xff]   ;;  %v1598_v42 = vld [vmem:[#allocation5 + $0x7c] ss:$12 sps:$4 sm:$0xff]   ;;  %v1602_v45 = vld [vmem:[#allocation5 + $0x94] ss:$12 sps:$4 sm:$0xff]  }
  0x63   :  { %357 = vmatprep.subr.bf16.mxu0 %v1586_v33  ;;  %v1600_v43 = vld [vmem:[#allocation5 + $0x68] ss:$12 sps:$4 sm:$0xff]   ;;  %v1601_v44 = vld [vmem:[#allocation5 + $0x78] ss:$12 sps:$4 sm:$0xff]   ;;  %v1604_v46 = vld [vmem:[#allocation5 + $0x80] ss:$12 sps:$4 sm:$0xff]  }
  0x64   :  { %v1605_v48 = vld [vmem:[#allocation5 + $0x90] ss:$12 sps:$4 sm:$0xff]   ;;  %v1606_v49 = vld [vmem:[#allocation5 + $0xac] ss:$12 sps:$4 sm:$0xff]   ;;  %v1609_v51 = vld [vmem:[#allocation5 + $0xa8] ss:$12 sps:$4 sm:$0xff]  }
  0x65   :  { %1439 = vmatpush3.bf16.msra.mxu1 %v1588_v34  ;;  %v1608_v50 = vld [vmem:[#allocation5 + $0x98] ss:$12 sps:$4 sm:$0xff]   ;;  %v1610_v52 = vld [vmem:[#allocation5 + $0xb0] ss:$12 sps:$4 sm:$0xff]   ;;  %v1322_v7 = vld [vmem:[%s2125_s1] ss:$0 sm:$0xff] }
  0x66   :  { %358 = vmatpush1.bf16.msra.mxu0 %v1589_v35  ;;  %1440 = vmatprep.subr.bf16.mxu1 %v1592_v37 }
  0x67   :  { %359 = vmatprep.subr.bf16.mxu0 %v1590_v36 }
  0x69   :  { %1441 = vmatpush3.bf16.msra.mxu1 %v1592_v37 }
  0x6a   :  { %360 = vmatpush1.bf16.msra.mxu0 %v1593_v38  ;;  %1442 = vmatprep.subr.bf16.mxu1 %v1596_v40 }
  0x6b   :  { %361 = vmatprep.subr.bf16.mxu0 %v1594_v39 }
  0x6d   :  { %1443 = vmatpush3.bf16.msra.mxu1 %v1596_v40 }
  0x6e   :  { %362 = vmatpush1.bf16.msra.mxu0 %v1597_v41  ;;  %1444 = vmatprep.subr.bf16.mxu1 %v1600_v43 }
  0x6f   :  { %363 = vmatprep.subr.bf16.mxu0 %v1598_v42 }
  0x71   :  { %1445 = vmatpush3.bf16.msra.mxu1 %v1600_v43 }
  0x72   :  { %364 = vmatpush1.bf16.msra.mxu0 %v1601_v44  ;;  %1446 = vmatprep.subr.bf16.mxu1 %v1604_v46 }
  0x73   :  { %365 = vmatprep.subr.bf16.mxu0 %v1602_v45 }
  0x75   :  { %1447 = vmatpush3.bf16.msra.mxu1 %v1604_v46 }
  0x76   :  { %366 = vmatpush1.bf16.msra.mxu0 %v1605_v48  ;;  %1448 = vmatprep.subr.bf16.mxu1 %v1608_v50 }
  0x77   :  { %367 = vmatprep.subr.bf16.mxu0 %v1606_v49 }
  0x79   :  { %1449 = vmatpush3.bf16.msra.mxu1 %v1608_v50 }
  0x7a   :  { %368 = vmatpush1.bf16.msra.mxu0 %v1609_v51  ;;  %1450 = vmatprep.subr.bf16.mxu1 %v1610_v52 }
  0x7b   :  { %1456 = vmatprep.subr.bf16.mxu0 %v1818_v14 }
  0x7d   :  { %1451 = vmatpush3.bf16.msra.mxu1 %v1610_v52 }
  0x7e   :  { %1468 = vmatprep.subr.bf16.mxu1 %v1818_v14 }
  0xe9   :  { %v124_v10 = vpop.xlane.xlu0 %123  ;;  %v128_v11 = vpop.xlane.xlu1 %127 }
  0xea   :  { %v131_v12 = vmul.f32 0.03125, %v124_v10  ;;  %v133_v13 = vmul.f32 0.03125, %v128_v11 }
  0xec   :  { %v135_v16 = vsub.f32 %v1954_v0, %v131_v12  ;;  %v137_v17 = vsub.f32 %v1956_v1, %v133_v13  ;;  %v1323_v12 = vld [vmem:[%s2126_s2] ss:$0 sm:$0xff] }
  0xed   :  { %v126_v18 = vpop.xlane.xlu0 %125  ;;  %v130_v19 = vpop.xlane.xlu1 %129 }
  0xee   :  { %v132_v20 = vmul.f32 0.03125, %v126_v18  ;;  %v134_v21 = vmul.f32 0.03125, %v130_v19  ;;  %v1972_v22 = vmul.f32 %v1967_v15, %v135_v16  ;;  %v1975_v23 = vmul.f32 %v1967_v15, %v137_v17 }
  0xf0   :  { %v136_v24 = vsub.f32 %v1958_v2, %v132_v20  ;;  %v138_v25 = vsub.f32 %v1962_v3, %v134_v21  ;;  %v143_v26 = vmul.f32 %v1972_v22, %v1972_v22  ;;  %v145_v27 = vmul.f32 %v1975_v23, %v1975_v23 }
  0xf2   :  { %147 = vadd.xlane.f32.xlu0 %v143_v26  ;;  %v1984_v28 = vmul.f32 %v1967_v15, %v136_v24  ;;  %v1987_v29 = vmul.f32 %v1967_v15, %v138_v25 }
  0xf4   :  { %v144_v30 = vmul.f32 %v1984_v28, %v1984_v28  ;;  %v146_v31 = vmul.f32 %v1987_v29, %v1987_v29 }
  0xf6   :  { %151 = vadd.xlane.f32.xlu0 %v145_v27  ;;  %149 = vadd.xlane.f32.xlu1 %v144_v30 }
  0xfa   :  { %153 = vadd.xlane.f32.xlu1 %v146_v31 }
 0x17f   :  { %v148_v53 = vpop.xlane.xlu0 %147 }
 0x180   :  { %v155_v54 = vmul.f32 0.03125, %v148_v53 }
 0x182   :  { %v159_v55 = vadd.f32 1e-05, %v155_v54 }
 0x183   :  { %v150_v56 = vpop.xlane.xlu1 %149  ;;  %v152_v57 = vpop.xlane.xlu0 %151 }
 0x184   :  { %1635 = vrsqrt.f32 %v159_v55  ;;  %v156_v58 = vmul.f32 0.03125, %v150_v56  ;;  %v157_v59 = vmul.f32 0.03125, %v152_v57 }
 0x186   :  { %v160_v60 = vadd.f32 1e-05, %v156_v58  ;;  %v161_v61 = vadd.f32 1e-05, %v157_v59 }
 0x187   :  { %v154_v62 = vpop.xlane.xlu1 %153 }
 0x188   :  { %1637 = vrsqrt.f32 %v160_v60  ;;  %v158_v63 = vmul.f32 0.03125, %v154_v62 }
 0x189   :  { %1639 = vrsqrt.f32 %v161_v61 }
 0x18a   :  { %v162_v4 = vadd.f32 1e-05, %v158_v63 }
 0x18c   :  { %1641 = vrsqrt.f32 %v162_v4 }
 0x18e   :  { %v1636_v5 = vpop.eup %1635 }
 0x18f   :  { %v167_v6 = vmul.f32 %v1636_v5, %v1972_v22 }
 0x191   :  { %v177_v11 = vmul.f32 %v1322_v7, %v167_v6 }
 0x192   :  { %v1638_v8 = vpop.eup %1637 }
 0x193   :  { %v1640_v9 = vpop.eup %1639  ;;  %v168_v10 = vmul.f32 %v1638_v8, %v1984_v28  ;;  %v187_v18 = vadd.f32 %v1323_v12, %v177_v11 }
 0x194   :  { %v169_v13 = vmul.f32 %v1640_v9, %v1975_v23 }
 0x195   :  { %v178_v16 = vmul.f32 %v1322_v7, %v168_v10 }
 0x196   :  { %v1642_v17 = vpop.eup %1641  ;;  %v179_v21 = vmul.f32 %v1322_v7, %v169_v13 }
 0x197   :  { %v188_v19 = vadd.f32 %v1323_v12, %v178_v16  ;;  %v170_v20 = vmul.f32 %v1642_v17, %v1987_v29 }
 0x198   :  { %v189_v25 = vadd.f32 %v1323_v12, %v179_v21 }
 0x199   :  { %v191_v22 = vpack.c.bf16 %v188_v19, %v187_v18  ;;  %v180_v24 = vmul.f32 %v1322_v7, %v170_v20 }
 0x19b   :  { %386 = vmatmul.mubr.bf16.vlgmr.msra.gmra.mrb[0].mxu0 %v191_v22  ;;  %1452 = vmatprep.mubr.bf16.mxu1 %v191_v22  ;;  %v190_v26 = vadd.f32 %v1323_v12, %v180_v24 }
 0x19c   :  { %395 = vmatprep.mubr.bf16.mxu0 %v1819_v47 }
 0x19d   :  { %v192_v27 = vpack.c.bf16 %v190_v26, %v189_v25 }
 0x19f   :  { %1453 = vmatmul.mubr.bf16.vlgmr.msra.gmra.mrb[0].mxu1 %v192_v27 }
 0x1a0   :  { %1470 = vmatprep.mubr.msk.bf16.mxu1 %vm1820_vm1, %v1818_v14 }
 0x1a3   :  { %396 = vmatmul.mubr.bf16.gmra.mrb[4].mxu0 %v192_v27 }
 0x1a4   :  { %1458 = vmatprep.mubr.msk.bf16.mxu0 %vm1820_vm1, %v1818_v14 }
 0x26e   :  { %v387_v23 = vpop.f32.mrb[0].mxu0 }
 0x26f   :  { %v455_v28 = vpack.c.bf16 %v387_v23, %v387_v23  ;;  %v389_v29 = vpop.f32.mrb[1].mxu0 }
 0x270   :  { %v391_v30 = vpop.f32.mrb[2].mxu0  ;;  %v459_v39 = vpack.c.bf16 %v389_v29, %v389_v29 }
 0x271   :  { %v393_v31 = vpop.f32.mrb[3].mxu0  ;;  %1457 = vmatpush3.bf16.xpose.msra.mxu0 %v455_v28  ;;  %v456_v41 = vpack.c.bf16 %v391_v30, %v391_v30 }
 0x272   :  { %v1454_v32 = vpop.f32.mrb[0].mxu1  ;;  %1462 = vmatprep.subr.bf16.mxu0 %v1818_v14  ;;  %v460_v48 = vpack.c.bf16 %v393_v31, %v393_v31 }
 0x273   :  { %v465_v33 = vpack.c.bf16 %v1454_v32, %v1454_v32  ;;  %v440_v34 = vpop.f32.mrb[1].mxu1 }
 0x274   :  { %v1455_v35 = vpop.f32.mrb[2].mxu1  ;;  %v463_v47 = vpack.c.bf16 %v440_v34, %v440_v34 }
 0x275   :  { %v2011_v36 = vsel %vm679_vm2, %v465_v33, 0  ;;  %v466_v37 = vpack.c.bf16 %v1455_v35, %v1455_v35  ;;  %v443_v38 = vpop.f32.mrb[3].mxu1 }
 0x276   :  { %v397_v40 = vpop.f32.mrb[4].mxu0  ;;  %v681_v51 = vsel %vm679_vm2, %v463_v47, 0  ;;  %v464_v52 = vpack.c.bf16 %v443_v38, %v443_v38 }
 0x277   :  { %v2014_v42 = vsel %vm679_vm2, %v466_v37, 0  ;;  %v457_v43 = vpack.c.bf16 %v397_v40, %v397_v40  ;;  %v399_v44 = vpop.f32.mrb[5].mxu0 }
 0x278   :  { %v401_v45 = vpop.f32.mrb[6].mxu0  ;;  %1459 = vmatmul.mubr.bf16.vlgmr.msra.gmra.mrb[8].mxu0 %v459_v39  ;;  %v461_v49 = vpack.c.bf16 %v399_v44, %v399_v44  ;;  %v727_v54 = vsel %vm679_vm2, %v464_v52, 0 }
 0x279   :  { %v403_v46 = vpop.f32.mrb[7].mxu0  ;;  %1463 = vmatpush3.bf16.xpose.msra.mxu0 %v456_v41  ;;  %1469 = vmatpush3.bf16.xpose.msra.mxu1 %v457_v43  ;;  %v458_v50 = vpack.c.bf16 %v401_v45, %v401_v45  ;;  %v1611_v45 = vld [vmem:[#allocation7] sm:$0xff]  }
 0x27a   :  { %1464 = vmatprep.mubr.msk.bf16.mxu0 %vm1820_vm1, %v1818_v14  ;;  %1474 = vmatprep.subr.bf16.mxu0 %v1818_v14  ;;  %v462_v53 = vpack.c.bf16 %v403_v46, %v403_v46 }
 0x27b   :  { %1480 = vmatprep.subr.bf16.mxu1 %v1818_v14 }
 0x280   :  { %1465 = vmatmul.mubr.bf16.vlgmr.msra.gmra.mrb[12].mxu0 %v460_v48  ;;  %1471 = vmatmul.mubr.bf16.vlgmr.msra.gmra.mrb[4].mxu1 %v461_v49 }
 0x281   :  { %1475 = vmatpush3.bf16.xpose.msra.mxu0 %v458_v50  ;;  %1481 = vmatpush3.bf16.msra.mxu1 %v681_v51 }
 0x282   :  { %1476 = vmatprep.mubr.msk.bf16.mxu0 %vm1820_vm1, %v1818_v14  ;;  %1486 = vmatprep.subr.bf16.mxu0 %v1818_v14 }
 0x283   :  { %1482 = vmatprep.mubr.msk.bf16.mxu1 %vm1820_vm1, %v1818_v14  ;;  %1492 = vmatprep.subr.bf16.mxu1 %v1818_v14 }
 0x288   :  { %1477 = vmatmul.mubr.bf16.vlgmr.msra.gmra.mrb[16].mxu0 %v462_v53  ;;  %v1612_v53 = vld [vmem:[#allocation7 + $0x8] sm:$0xff]  }
 0x289   :  { %1487 = vmatpush3.bf16.msra.mxu0 %v727_v54  ;;  %1488 = vmatprep.mubr.msk.bf16.mxu0 %vm1820_vm1, %v1818_v14 }
 0x28a   :  { %1498 = vmatprep.subr.bf16.mxu0 %v1818_v14 }
 0x34b   :  { %v501_v55 = vpop.f32.mrb[8].mxu0 }
 0x34c   :  { %v1460_v56 = vpop.f32.mrb[9].mxu0  ;;  %v628_v57 = vsel %vm627_vm3, %v501_v55, -inf }
 0x34d   :  { %629 = vmax.xlane.f32.xlu0 %v628_v57  ;;  %v504_v58 = vpop.f32.mrb[10].mxu0  ;;  %v1614_v57 = vld [vmem:[#allocation7 + $0x18] sm:$0xff]  }
 0x34e   :  { %v1461_v59 = vpop.f32.mrb[11].mxu0  ;;  %v1615_v58 = vld [vmem:[#allocation7 + $0x20] sm:$0xff]  }
 0x34f   :  { %v1616_v59 = vld [vmem:[#allocation7 + $0x28] sm:$0xff]  }
 0x353   :  { %v541_v60 = vpop.f32.mrb[12].mxu0  ;;  %v581_v61 = vpop.f32.mrb[4].mxu1 }
 0x354   :  { %v1466_v62 = vpop.f32.mrb[13].mxu0  ;;  %v1472_v63 = vpop.f32.mrb[5].mxu1  ;;  %v634_v4 = vsel %vm627_vm3, %v581_v61, -inf  ;;  %v631_v5 = vsel %vm627_vm3, %v541_v60, -inf }
 0x355   :  { %v584_v6 = vpop.f32.mrb[6].mxu1  ;;  %635 = vmax.xlane.f32.xlu0 %v634_v4  ;;  %632 = vmax.xlane.f32.xlu1 %v631_v5  ;;  %v544_v7 = vpop.f32.mrb[14].mxu0 }
 0x356   :  { %v1467_v8 = vpop.f32.mrb[15].mxu0  ;;  %v1473_v9 = vpop.f32.mrb[7].mxu1 }
 0x35b   :  { %v621_v10 = vpop.f32.mrb[16].mxu0 }
 0x35c   :  { %v1478_v11 = vpop.f32.mrb[17].mxu0  ;;  %v637_v12 = vsel %vm627_vm3, %v621_v10, -inf }
 0x35d   :  { %638 = vmax.xlane.f32.xlu1 %v637_v12  ;;  %v624_v13 = vpop.f32.mrb[18].mxu0 }
 0x35e   :  { %v1479_v16 = vpop.f32.mrb[19].mxu0 }
 0x3da   :  { %v630_v17 = vpop.xlane.xlu0 %629 }
 0x3db   :  { %v640_v18 = vsub.f32 %v501_v55, %v630_v17 }
 0x3dd   :  { %v644_v19 = vmul.f32 1.442695, %v640_v18 }
 0x3df   :  { %1643 = vpow2.f32 %v644_v19 }
 0x3e2   :  { %v636_v20 = vpop.xlane.xlu0 %635  ;;  %v633_v21 = vpop.xlane.xlu1 %632 }
 0x3e3   :  { %v642_v22 = vsub.f32 %v581_v61, %v636_v20  ;;  %v641_v24 = vsub.f32 %v541_v60, %v633_v21 }
 0x3e5   :  { %v648_v25 = vmul.f32 1.442695, %v642_v22  ;;  %v646_v26 = vmul.f32 1.442695, %v641_v24 }
 0x3e7   :  { %1645 = vpow2.f32 %v648_v25 }
 0x3e8   :  { %1647 = vpow2.f32 %v646_v26 }
 0x3e9   :  { %v1644_v27 = vpop.eup %1643 }
 0x3ea   :  { %v639_v23 = vpop.xlane.xlu1 %638  ;;  %v652_v28 = vsel %vm627_vm3, %v1644_v27, 0.0 }
 0x3eb   :  { %v643_v29 = vsub.f32 %v621_v10, %v639_v23  ;;  %653 = vadd.xlane.f32.xlu0 %v652_v28 }
 0x3ed   :  { %v650_v30 = vmul.f32 1.442695, %v643_v29 }
 0x3ef   :  { %1649 = vpow2.f32 %v650_v30 }
 0x3f1   :  { %v1646_v31 = vpop.eup %1645 }
 0x3f2   :  { %v1648_v32 = vpop.eup %1647  ;;  %v658_v33 = vsel %vm627_vm3, %v1646_v31, 0.0 }
 0x3f3   :  { %659 = vadd.xlane.f32.xlu0 %v658_v33  ;;  %v655_v34 = vsel %vm627_vm3, %v1648_v32, 0.0 }
 0x3f4   :  { %656 = vadd.xlane.f32.xlu1 %v655_v34 }
 0x3f9   :  { %v1650_v35 = vpop.eup %1649 }
 0x3fa   :  { %v661_v37 = vsel %vm627_vm3, %v1650_v35, 0.0 }
 0x3fb   :  { %662 = vadd.xlane.f32.xlu1 %v661_v37 }
 0x478   :  { %v654_v38 = vpop.xlane.xlu0 %653 }
 0x479   :  { %1651 = vrcp.f32 %v654_v38 }
 0x480   :  { %v660_v39 = vpop.xlane.xlu0 %659 }
 0x481   :  { %1653 = vrcp.f32 %v660_v39  ;;  %v657_v40 = vpop.xlane.xlu1 %656 }
 0x482   :  { %1655 = vrcp.f32 %v657_v40 }
 0x483   :  { %v1652_v41 = vpop.eup %1651 }
 0x484   :  { %v668_v43 = vmul.f32 %v1652_v41, %v1644_v27 }
 0x486   :  { %v672_v44 = vpack.c.bf16 %v668_v43, %v668_v43 }
 0x488   :  { %1483 = vmatmul.mubr.msk.bf16.vlgmr.msra.gmra.mrb[8].mxu1 %vm627_vm3, %v672_v44  ;;  %v663_v46 = vpop.xlane.xlu1 %662 }
 0x489   :  { %1493 = vmatpush3.bf16.msra.mxu1 %v2011_v36  ;;  %1657 = vrcp.f32 %v663_v46  ;;  %1494 = vmatprep.mubr.msk.bf16.mxu1 %vm1820_vm1, %v1818_v14  ;;  %v1613_v36 = vld [vmem:[#allocation7 + $0x10] sm:$0xff]  }
 0x48a   :  { %1504 = vmatprep.subr.bf16.mxu1 %v1611_v45 }
 0x48b   :  { %v1654_v47 = vpop.eup %1653 }
 0x48c   :  { %v1656_v48 = vpop.eup %1655  ;;  %v670_v49 = vmul.f32 %v1654_v47, %v1646_v31  ;;  %v1620_v47 = vld [vmem:[#allocation8 + $0x8] sm:$0xff]  }
 0x48d   :  { %v669_v50 = vmul.f32 %v1656_v48, %v1648_v32  ;;  %v1621_v48 = vld [vmem:[#allocation8 + $0x10] sm:$0xff]  }
 0x48e   :  { %v674_v51 = vpack.c.bf16 %v670_v49, %v670_v49  ;;  %v1622_v49 = vld [vmem:[#allocation8 + $0x18] sm:$0xff]  }
 0x48f   :  { %v673_v52 = vpack.c.bf16 %v669_v50, %v669_v50  ;;  %v1623_v50 = vld [vmem:[#allocation8 + $0x20] sm:$0xff]  }
 0x490   :  { %1495 = vmatmul.mubr.msk.bf16.vlgmr.msra.gmra.mrb[12].mxu1 %vm627_vm3, %v674_v51  ;;  %v1624_v51 = vld [vmem:[#allocation8 + $0x28] sm:$0xff]  }
 0x491   :  { %1489 = vmatmul.mubr.msk.bf16.vlgmr.msra.gmra.mrb[20].mxu0 %vm627_vm3, %v673_v52  ;;  %1505 = vmatpush3.bf16.msra.mxu1 %v1611_v45  ;;  %v1626_v52 = vld [vmem:[#allocation8 + $0x38] sm:$0xff]  }
 0x492   :  { %1499 = vmatpush3.bf16.msra.mxu0 %v2014_v42  ;;  %1500 = vmatprep.mubr.msk.bf16.mxu0 %vm1820_vm1, %v1818_v14  ;;  %v1617_v14 = vld [vmem:[#allocation7 + $0x30] sm:$0xff]   ;;  %v1618_v42 = vld [vmem:[#allocation7 + $0x38] sm:$0xff]  }
 0x493   :  { %v1658_v54 = vpop.eup %1657  ;;  %1506 = vmatprep.subr.bf16.mxu1 %v1612_v53 }
 0x494   :  { %v671_v55 = vmul.f32 %v1658_v54, %v1650_v35  ;;  %v1629_v54 = vld [vmem:[#allocation10 + $0x10] sm:$0xff]  }
 0x495   :  { %1507 = vmatpush3.bf16.msra.mxu1 %v1612_v53  ;;  %v1627_v53 = vld [vmem:[#allocation10] sm:$0xff]  }
 0x496   :  { %v675_v56 = vpack.c.bf16 %v671_v55, %v671_v55  ;;  %1508 = vmatprep.subr.bf16.mxu1 %v1613_v36  ;;  %v1630_v55 = vld [vmem:[#allocation10 + $0x18] sm:$0xff]  }
 0x499   :  { %1501 = vmatmul.mubr.msk.bf16.vlgmr.msra.gmra.mrb[24].mxu0 %vm627_vm3, %v675_v56  ;;  %1509 = vmatpush3.bf16.msra.mxu1 %v1613_v36  ;;  %v1628_v36 = vld [vmem:[#allocation10 + $0x8] sm:$0xff]   ;;  %v1631_v56 = vld [vmem:[#allocation10 + $0x20] sm:$0xff]  }
 0x49a   :  { %1510 = vmatprep.subr.bf16.mxu1 %v1614_v57 }
 0x49d   :  { %1511 = vmatpush3.bf16.msra.mxu1 %v1614_v57  ;;  %v1632_v57 = vld [vmem:[#allocation10 + $0x28] sm:$0xff]  }
 0x49e   :  { %1512 = vmatprep.subr.bf16.mxu1 %v1615_v58 }
 0x4a1   :  { %1513 = vmatpush3.bf16.msra.mxu1 %v1615_v58 }
 0x4a2   :  { %1514 = vmatprep.subr.bf16.mxu1 %v1616_v59 }
 0x4a5   :  { %1515 = vmatpush3.bf16.msra.mxu1 %v1616_v59 }
 0x4a6   :  { %1516 = vmatprep.subr.bf16.mxu1 %v1617_v14 }
 0x4a9   :  { %1517 = vmatpush3.bf16.msra.mxu1 %v1617_v14 }
 0x4aa   :  { %1518 = vmatprep.subr.bf16.mxu1 %v1618_v42 }
 0x4ad   :  { %1519 = vmatpush3.bf16.msra.mxu1 %v1618_v42 }
 0x4ae   :  { %1544 = vmatprep.subr.bf16.mxu1 %v1627_v53 }
 0x55b   :  { %v717_v60 = vpop.f32.mrb[8].mxu1 }
 0x55c   :  { %v1484_v61 = vpop.f32.mrb[9].mxu1 }
 0x55d   :  { %v720_v62 = vpop.f32.mrb[10].mxu1 }
 0x55e   :  { %v1485_v63 = vpop.f32.mrb[11].mxu1 }
 0x563   :  { %v809_v4 = vpop.f32.mrb[12].mxu1 }
 0x564   :  { %v763_v5 = vpop.f32.mrb[20].mxu0  ;;  %v1496_v6 = vpop.f32.mrb[13].mxu1 }
 0x565   :  { %v861_v7 = vpack.c.bf16 %v763_v5, %v717_v60  ;;  %v1490_v8 = vpop.f32.mrb[21].mxu0  ;;  %v812_v9 = vpop.f32.mrb[14].mxu1 }
 0x566   :  { %v766_v10 = vpop.f32.mrb[22].mxu0  ;;  %v1497_v11 = vpop.f32.mrb[15].mxu1  ;;  %v1360_v9 = vld [vmem:[%s2129_s5] ss:$0 sm:$0xff] }
 0x567   :  { %v1491_v12 = vpop.f32.mrb[23].mxu0  ;;  %1520 = vmatprep.mubr.bf16.mxu1 %v861_v7 }
 0x56c   :  { %v855_v13 = vpop.f32.mrb[24].mxu0 }
 0x56d   :  { %v862_v16 = vpack.c.bf16 %v855_v13, %v809_v4  ;;  %v1502_v17 = vpop.f32.mrb[25].mxu0 }
 0x56e   :  { %v858_v18 = vpop.f32.mrb[26].mxu0  ;;  %v1361_v17 = vld [vmem:[%s2130_s6] ss:$0 sm:$0xff] }
 0x56f   :  { %v1503_v19 = vpop.f32.mrb[27].mxu0  ;;  %1521 = vmatmul.mubr.bf16.vlgmr.msra.gmra.mrb[16].mxu1 %v862_v16 }
 0x570   :  { %1545 = vmatpush3.bf16.msra.mxu1 %v1627_v53 }
 0x571   :  { %1546 = vmatprep.subr.bf16.mxu1 %v1628_v36 }
 0x574   :  { %1547 = vmatpush3.bf16.msra.mxu1 %v1628_v36 }
 0x575   :  { %1548 = vmatprep.subr.bf16.mxu1 %v1629_v54 }
 0x578   :  { %1549 = vmatpush3.bf16.msra.mxu1 %v1629_v54 }
 0x579   :  { %1550 = vmatprep.subr.bf16.mxu1 %v1630_v55 }
 0x57c   :  { %1551 = vmatpush3.bf16.msra.mxu1 %v1630_v55 }
 0x57d   :  { %1552 = vmatprep.subr.bf16.mxu1 %v1631_v56 }
 0x580   :  { %1553 = vmatpush3.bf16.msra.mxu1 %v1631_v56 }
 0x581   :  { %1554 = vmatprep.subr.bf16.mxu1 %v1632_v57 }
 0x584   :  { %1555 = vmatpush3.bf16.msra.mxu1 %v1632_v57 }
 0x642   :  { %v1522_v20 = vpop.f32.mrb[16].mxu1 }
 0x643   :  { %v961_v21 = vpop.f32.mrb[17].mxu1  ;;  %v2057_v27 = vadd.f32 %v1522_v20, %v1956_v1 }
 0x644   :  { %v2050_v22 = vadd.f32 %v961_v21, %v1954_v0  ;;  %v1523_v24 = vpop.f32.mrb[18].mxu1  ;;  %v1619_v0 = vld [vmem:[#allocation8] sm:$0xff]  }
 0x645   :  { %v964_v25 = vpop.f32.mrb[19].mxu1  ;;  %v2061_v23 = vadd.f32 %v1523_v24, %v1962_v3  ;;  %1524 = vmatprep.subr.bf16.mxu0 %v1619_v0 }
 0x646   :  { %v2053_v26 = vadd.f32 %v964_v25, %v1958_v2  ;;  %980 = vadd.xlane.f32.xlu0 %v2050_v22  ;;  %1525 = vmatpush3.bf16.msra.mxu0 %v1619_v0 }
 0x647   :  { %1526 = vmatprep.subr.bf16.mxu0 %v1620_v47 }
 0x648   :  { %982 = vadd.xlane.f32.xlu1 %v2053_v26 }
 0x64a   :  { %984 = vadd.xlane.f32.xlu0 %v2057_v27  ;;  %1527 = vmatpush3.bf16.msra.mxu0 %v1620_v47 }
 0x64b   :  { %1528 = vmatprep.subr.bf16.mxu0 %v1621_v48 }
 0x64c   :  { %986 = vadd.xlane.f32.xlu1 %v2061_v23 }
 0x64e   :  { %1529 = vmatpush3.bf16.msra.mxu0 %v1621_v48 }
 0x64f   :  { %1530 = vmatprep.subr.bf16.mxu0 %v1622_v49 }
 0x652   :  { %1531 = vmatpush3.bf16.msra.mxu0 %v1622_v49  ;;  %v1371_v49 = vld [vmem:[%s2134_s10] ss:$0 sm:$0xff] }
 0x653   :  { %1532 = vmatprep.subr.bf16.mxu0 %v1623_v50 }
 0x656   :  { %1533 = vmatpush3.bf16.msra.mxu0 %v1623_v50 }
 0x657   :  { %1534 = vmatprep.subr.bf16.mxu0 %v1624_v51 }
 0x65a   :  { %1535 = vmatpush3.bf16.msra.mxu0 %v1624_v51 }
 0x6d3   :  { %v981_v28 = vpop.xlane.xlu0 %980 }
 0x6d4   :  { %v988_v2 = vmul.f32 0.03125, %v981_v28 }
 0x6d5   :  { %v983_v29 = vpop.xlane.xlu1 %982 }
 0x6d6   :  { %v992_v30 = vsub.f32 %v2050_v22, %v988_v2  ;;  %v989_v31 = vmul.f32 0.03125, %v983_v29 }
 0x6d7   :  { %v985_v1 = vpop.xlane.xlu0 %984 }
 0x6d8   :  { %v993_v32 = vsub.f32 %v2053_v26, %v989_v31  ;;  %v990_v33 = vmul.f32 0.03125, %v985_v1  ;;  %v2068_v3 = vmul.f32 %v1967_v15, %v992_v30  ;;  %v1633_v1 = vld [vmem:[#allocation10 + $0x30] sm:$0xff]  }
 0x6d9   :  { %v987_v34 = vpop.xlane.xlu1 %986  ;;  %1556 = vmatprep.subr.bf16.mxu1 %v1633_v1 }
 0x6da   :  { %v994_v35 = vsub.f32 %v2057_v27, %v990_v33  ;;  %v991_v37 = vmul.f32 0.03125, %v987_v34  ;;  %v1000_v38 = vmul.f32 %v2068_v3, %v2068_v3  ;;  %v2074_v39 = vmul.f32 %v1967_v15, %v993_v32  ;;  %1557 = vmatpush3.bf16.msra.mxu1 %v1633_v1  ;;  %v1634_v32 = vld [vmem:[#allocation10 + $0x38] sm:$0xff]   ;;  %v1362_v33 = vld [vmem:[%s2132_s8] ss:$0 sm:$0xff]  ;;  %s1821_s8 = smov [#allocation11]  }
 0x6db   :  { %1558 = vmatprep.subr.bf16.mxu1 %v1634_v32  ;;  %s1307_s12 = sshll.u32 %s1821_s8, 4  ;;  %s1308_s12 = int_to_ptr.vmem [resolvable:$true] %s1307_s12 }
 0x6dc   :  { %v995_v40 = vsub.f32 %v2061_v23, %v991_v37  ;;  %1004 = vadd.xlane.f32.xlu0 %v1000_v38  ;;  %v1001_v41 = vmul.f32 %v2074_v39, %v2074_v39  ;;  %v2080_v43 = vmul.f32 %v1967_v15, %v994_v35  ;;  %s1777_s10 = scalar_lea.vmem %s1308_s12, 512  ;;  %p1782_p13 = scmp.lt.s32.totalorder %s1308_s12, %s1308_s12 }
 0x6dd   :  { %p1778_p12 = scmp.ne.s32.totalorder %s1308_s12, %s1777_s10  ;;  %p1783_p0 = scmp.lt.s32.totalorder %s1777_s10, %s1777_s10 }
 0x6de   :  { %1006 = vadd.xlane.f32.xlu1 %v1001_v41  ;;  %v1002_v44 = vmul.f32 %v2080_v43, %v2080_v43  ;;  %v2085_v45 = vmul.f32 %v1967_v15, %v995_v40  ;;  %v1625_v15 = vld [vmem:[#allocation8 + $0x30] sm:$0xff]   ;;  %1559 = vmatpush3.bf16.msra.mxu1 %v1634_v32 }
 0x6df   :  { %1536 = vmatprep.subr.bf16.mxu0 %v1625_v15  ;;  %p1784_p1 = por %p1783_p0, %p1782_p13 }
 0x6e0   :  { %1008 = vadd.xlane.f32.xlu0 %v1002_v44  ;;  %v1003_v46 = vmul.f32 %v2085_v45, %v2085_v45  ;;  %1537 = vmatpush3.bf16.msra.mxu0 %v1625_v15 }
 0x6e1   :  { %1538 = vmatprep.subr.bf16.mxu0 %v1626_v52  ;;  %p1785_p2 = pnand %p1784_p1, %p1778_p12 }
 0x6e2   :  { %1010 = vadd.xlane.f32.xlu1 %v1003_v46 }
 0x6e4   :  { %1539 = vmatpush3.bf16.msra.mxu0 %v1626_v52 }
 0x769   :  { %v1005_v58 = vpop.xlane.xlu0 %1004 }
 0x76a   :  { %v1012_v59 = vmul.f32 0.03125, %v1005_v58 }
 0x76b   :  { %v1007_v14 = vpop.xlane.xlu1 %1006 }
 0x76c   :  { %v1016_v42 = vadd.f32 1e-05, %v1012_v59  ;;  %v1013_v60 = vmul.f32 0.03125, %v1007_v14 }
 0x76d   :  { %v1009_v61 = vpop.xlane.xlu0 %1008 }
 0x76e   :  { %1659 = vrsqrt.f32 %v1016_v42  ;;  %v1017_v62 = vadd.f32 1e-05, %v1013_v60  ;;  %v1014_v63 = vmul.f32 0.03125, %v1009_v61 }
 0x76f   :  { %v1011_v4 = vpop.xlane.xlu1 %1010 }
 0x770   :  { %1661 = vrsqrt.f32 %v1017_v62  ;;  %v1018_v5 = vadd.f32 1e-05, %v1014_v63  ;;  %v1015_v6 = vmul.f32 0.03125, %v1011_v4 }
 0x772   :  { %1663 = vrsqrt.f32 %v1018_v5  ;;  %v1019_v7 = vadd.f32 1e-05, %v1015_v6 }
 0x774   :  { %1665 = vrsqrt.f32 %v1019_v7 }
 0x778   :  { %v1660_v8 = vpop.eup %1659 }
 0x779   :  { %v1024_v10 = vmul.f32 %v1660_v8, %v2068_v3 }
 0x77a   :  { %v1662_v11 = vpop.eup %1661 }
 0x77b   :  { %v1025_v12 = vmul.f32 %v1662_v11, %v2074_v39  ;;  %v1034_v13 = vmul.f32 %v1360_v9, %v1024_v10 }
 0x77c   :  { %v1664_v16 = vpop.eup %1663 }
 0x77d   :  { %v1026_v18 = vmul.f32 %v1664_v16, %v2080_v43  ;;  %v1035_v19 = vmul.f32 %v1360_v9, %v1025_v12  ;;  %v1044_v24 = vadd.f32 %v1361_v17, %v1034_v13 }
 0x77e   :  { %v1666_v20 = vpop.eup %1665 }
 0x77f   :  { %v1027_v21 = vmul.f32 %v1666_v20, %v2085_v45  ;;  %v1045_v25 = vadd.f32 %v1361_v17, %v1035_v19  ;;  %v1036_v0 = vmul.f32 %v1360_v9, %v1026_v18 }
 0x781   :  { %v1048_v28 = vpack.c.bf16 %v1045_v25, %v1044_v24  ;;  %v1037_v2 = vmul.f32 %v1360_v9, %v1027_v21  ;;  %v1046_v29 = vadd.f32 %v1361_v17, %v1036_v0 }
 0x783   :  { %1540 = vmatprep.mubr.bf16.mxu0 %v1048_v28  ;;  %v1047_v30 = vadd.f32 %v1361_v17, %v1037_v2 }
 0x785   :  { %v1049_v31 = vpack.c.bf16 %v1047_v30, %v1046_v29 }
 0x787   :  { %1541 = vmatmul.mubr.bf16.vlgmr.msra.gmra.mrb[28].mxu0 %v1049_v31 }
 0x85a   :  { %v1542_v3 = vpop.f32.mrb[28].mxu0 }
 0x85b   :  { %v1163_v34 = vadd.f32 %v1542_v3, %v1362_v33  ;;  %v1154_v35 = vpop.f32.mrb[29].mxu0 }
 0x85c   :  { %v1155_v37 = vadd.f32 %v1362_v33, %v1154_v35  ;;  %v1543_v38 = vpop.f32.mrb[30].mxu0 }
 0x85d   :  { %v1166_v39 = vadd.f32 %v1543_v38, %v1362_v33  ;;  %v1157_v40 = vpop.f32.mrb[31].mxu0  ;;  %v1171_v43 = vmax.f32 %v1163_v34, 0.0 }
 0x85e   :  { %v1158_v41 = vadd.f32 %v1362_v33, %v1157_v40  ;;  %v1169_v45 = vmax.f32 %v1155_v37, 0.0 }
 0x85f   :  { %v1172_v44 = vmax.f32 %v1166_v39, 0.0 }
 0x860   :  { %v1170_v46 = vmax.f32 %v1158_v41, 0.0 }
 0x861   :  { %v1174_v47 = vpack.c.bf16 %v1172_v44, %v1171_v43 }
 0x862   :  { %v1173_v48 = vpack.c.bf16 %v1170_v46, %v1169_v45 }
 0x864   :  { %1560 = vmatprep.mubr.bf16.mxu1 %v1173_v48 }
 0x865   :  { %1561 = vmatmul.mubr.bf16.vlgmr.msra.gmra.mrb[20].mxu1 %v1174_v47 }
 0x938   :  { %v1562_v50 = vpop.f32.mrb[20].mxu1 }
 0x939   :  { %v1288_v51 = vadd.f32 %v1562_v50, %v1371_v49  ;;  %v1279_v15 = vpop.f32.mrb[21].mxu1 }
 0x93a   :  { %v1280_v52 = vadd.f32 %v1371_v49, %v1279_v15  ;;  %v1563_v53 = vpop.f32.mrb[22].mxu1 }
 0x93b   :  { %v1296_v36 = vadd.f32 %v1288_v51, %v2057_v27  ;;  %v1291_v54 = vadd.f32 %v1563_v53, %v1371_v49  ;;  %v1282_v55 = vpop.f32.mrb[23].mxu1 }
 0x93c   :  { %v1294_v56 = vadd.f32 %v1280_v52, %v2050_v22  ;;  %v1283_v57 = vadd.f32 %v1371_v49, %v1282_v55 }
 0x93d   :  { %1300 = vst [vmem:[#allocation11 + $0x10] sm:$0xff] %v1296_v36  ;;  %v1297_v58 = vadd.f32 %v1291_v54, %v2061_v23 }
 0x93e   :  { %1298 = vst [vmem:[#allocation11] sm:$0xff] %v1294_v56  ;;  %v1295_v59 = vadd.f32 %v1283_v57, %v2053_v26 }
 0x93f   :  { %1301 = vst [vmem:[#allocation11 + $0x18] sm:$0xff] %v1297_v58 }
 0x940   :  { %1299 = vst [vmem:[#allocation11 + $0x8] sm:$0xff] %v1295_v59 }
 0x941   :  { %1788 = shalt.err (!%p1785_p2)
}
 0x942   :  { %s1789_s14 = scalar_lea.hbm %s2135_s11, 512 }
 0x943   :  { %p1790_p3 = scmp.ne.s32.totalorder %s2135_s11, %s1789_s14  ;;  %p1793_p4 = scmp.lt.u32.totalorder %s1789_s14, %s2135_s11 }
 0x945   :  { %p1795_p5 = pnand %p1793_p4, %p1790_p3 }
 0x947   :  { %1798 = shalt.err (!%p1795_p5)
}
 0x948   :  { %1313 = dma.vmem_to_hbm [thread:$0]  %s1308_s12, 512, %s2135_s11, [#allocation4], %s1814_s7, %s1814_s7, %s1815_s13  }
 0x949   :  { %1805 = dma.done.wait [#allocation4], 512  }
 0x94a   :  { %1806 = vsyncadd [#allocation4], 4294966784 }
 0x94b   :  { %1317 = vsyncpa [#allocation3], 1 }
 0x94c   :  { %1318 = vsyncpa [#allocation6], 1 }
 0x94d   :  { %1319 = vsyncpa [#allocation9], 1 }
 0x94e   :  { %1320 = vsyncpa [#allocation4], 1 }

</bundles_post_ra>
